<compile_context>
chip_gen: v5e
topology: v5e:2x2
jax: 0.10.0
libtpu: 0.0.40
codegen_flags: <defaults>
</compile_context>

<pallas_src>
import jax
import jax.numpy as jnp
from jax import lax
from jax.experimental import pallas as pl
from jax.experimental.pallas import tpu as pltpu


def _round_up(x, m):
    return (x + m - 1) // m * m


def _build_kernel(*, T, Tt, Bp, Hp, mask_tail, unroll):
    """Returns the chunked LSTM kernel closed over static sizes.

    Ref shapes:
      x_ref:  (1, Tt*Bp, Fp)  compute dtype (rows: time-major, batch-minor)
      wx_ref: (Fp, 4*Hp)      compute dtype
      wh_ref: (Hp, 4*Hp)      compute dtype
      b_ref:  (1, 4*Hp)       f32 (b_ih + b_hh)
      wo_ref: (Hp, Op)        compute dtype
      bo_ref: (1, Op)         f32
      o_ref:  (Bp, Op)        f32 output
      h_ref, c_ref: (Bp, Hp)  f32 scratch carried across grid steps
      gx_ref: (Tt*Bp, 4*Hp)   f32 scratch (per-chunk input projection)
    """

    def kernel(x_ref, wx_ref, wh_ref, b_ref, wo_ref, bo_ref, o_ref,
               h_ref, c_ref, gx_ref):
        k = pl.program_id(0)

        @pl.when(k == 0)
        def _init():
            h_ref[...] = jnp.zeros_like(h_ref)
            c_ref[...] = jnp.zeros_like(c_ref)

        # Input projection for the whole chunk: ONE big MXU matmul (+ bias),
        # instead of a tiny (Bp, Fp) matmul on the serial path every step.
        gx_ref[...] = (
            jnp.dot(x_ref[0], wx_ref[...], preferred_element_type=jnp.float32)
            + b_ref[...])

        wh = wh_ref[...]
        chunk_start = k * Tt

        def step(t, carry):
            h, c = carry
            row = pl.multiple_of(t * Bp, Bp)
            g = (gx_ref[pl.ds(row, Bp), :]
                 + jnp.dot(h.astype(wh.dtype), wh,
                           preferred_element_type=jnp.float32))
            # Gate layout (wrapper-reordered): [i | f | o | g] -> the three
            # sigmoid gates are one contiguous slice (single EUP issue).
            sig = jax.nn.sigmoid(g[:, :3 * Hp])
            i_g = sig[:, 0 * Hp:1 * Hp]
            f_g = sig[:, 1 * Hp:2 * Hp]
            o_g = sig[:, 2 * Hp:3 * Hp]
            g_g = jnp.tanh(g[:, 3 * Hp:4 * Hp])
            c_new = f_g * c + i_g * g_g
            h_new = o_g * jnp.tanh(c_new)
            if mask_tail:
                valid = (chunk_start + t) < T
                h_new = jnp.where(valid, h_new, h)
                c_new = jnp.where(valid, c_new, c)
            return h_new, c_new

        h_T, c_T = lax.fori_loop(0, Tt, step, (h_ref[...], c_ref[...]),
                                 unroll=unroll)
        h_ref[...] = h_T
        c_ref[...] = c_T

        # ReLU -> Linear head only on the final hidden state (the module
        # returns x[:, -1, :]), only on the last grid step.
        @pl.when(k == pl.num_programs(0) - 1)
        def _head():
            wo = wo_ref[...]
            a = jnp.maximum(h_T, 0.0).astype(wo.dtype)
            o_ref[...] = (jnp.dot(a, wo, preferred_element_type=jnp.float32)
                          + bo_ref[...])

    return kernel


def lstm_model_forward(x, params, *, time_chunk=None, compute_dtype=jnp.bfloat16):
    """x: (B, T, in_features) float32 (batch_first, like the PyTorch module).

    params (PyTorch layouts): w_ih (4H, F), w_hh (4H, H), b_ih (4H,), b_hh (4H,),
    w_fc (out, H), b_fc (out,).  Returns (B, out_features) float32."""
    w_ih, w_hh, b_ih, b_hh, w_fc, b_fc = (
        params[k] for k in ("w_ih", "w_hh", "b_ih", "b_hh", "w_fc", "b_fc"))
    B, T, F = x.shape
    H = w_hh.shape[1]
    out_features = w_fc.shape[0]

    # ---- padding to sublane(8) / lane(128) aligned tiles ---------------------
    Bp = _round_up(B, 8)
    Fp = _round_up(F, 128)
    Hp = _round_up(H, 128)          # each gate block lane-aligned
    Op = _round_up(out_features, 128)

    # ---- time chunking -------------------------------------------------------
    Tt = int(time_chunk) if time_chunk is not None else min(T, 64)
    Tt = max(1, min(Tt, T))
    num_chunks = -(-T // Tt)
    T_pad = num_chunks * Tt
    mask_tail = (T_pad != T)
    unroll = min(Tt, 8)

    # Kernel gate slots [i, f, o, g] <- PyTorch gate order [i, f, g, o].
    gate_src = (0, 1, 3, 2)

    def gate_pad_cols(w, dtype):    # (rows, 4H) -> (rows, 4*Hp), gates at k*Hp
        rows = w.shape[0]
        out = jnp.zeros((rows, 4 * Hp), dtype)
        for slot, src in enumerate(gate_src):
            out = out.at[:, slot * Hp:slot * Hp + H].set(
                w[:, src * H:(src + 1) * H].astype(dtype))
        return out

    def row_pad(w, rows_p):
        return jnp.zeros((rows_p, w.shape[1]), w.dtype).at[:w.shape[0]].set(w)

    wx = row_pad(gate_pad_cols(jnp.transpose(w_ih), compute_dtype), Fp)       # (Fp, 4Hp)
    wh = row_pad(gate_pad_cols(jnp.transpose(w_hh), compute_dtype), Hp)       # (Hp, 4Hp)
    b = gate_pad_cols((b_ih + b_hh).astype(jnp.float32)[None, :], jnp.float32)  # (1, 4Hp)
    wo = jnp.zeros((Hp, Op), compute_dtype).at[:H, :out_features].set(
        jnp.transpose(w_fc).astype(compute_dtype))                            # (Hp, Op)
    bo = jnp.zeros((1, Op), jnp.float32).at[0, :out_features].set(
        b_fc.astype(jnp.float32))                                             # (1, Op)

    # (B, T, F) -> (T, B, F) -> zero-pad -> (num_chunks, Tt*Bp, Fp).
    # Rows within a chunk are time-major, batch-minor (matches gx_ref slicing).
    x_tm = jnp.transpose(x, (1, 0, 2)).astype(compute_dtype)
    x_pad = jnp.zeros((T_pad, Bp, Fp), compute_dtype).at[:T, :B, :F].set(x_tm)
    x_chunks = x_pad.reshape(num_chunks, Tt * Bp, Fp)

    weights = [wx, wh, b, wo, bo]

    def resident_spec(a):           # constant index_map -> DMA'd once, resident
        n = a.ndim
        return pl.BlockSpec(a.shape, lambda k, _n=n: (0,) * _n)

    kernel = _build_kernel(T=T, Tt=Tt, Bp=Bp, Hp=Hp,
                           mask_tail=mask_tail, unroll=unroll)

    # Explicit VMEM budget (default scoped limit is only 16/32 MiB).
    cbytes = jnp.dtype(compute_dtype).itemsize
    vmem_bytes = (
        2 * Tt * Bp * Fp * cbytes                                # streamed x (2 bufs)
        + 2 * (Fp * 4 * Hp + Hp * 4 * Hp + Hp * Op) * cbytes     # resident weights
        + 2 * (4 * Hp + Op) * 4                                  # biases (f32)
        + 2 * Bp * Op * 4                                        # output block
        + (2 * Bp * Hp + Tt * Bp * 4 * Hp) * 4                   # h, c, gx scratch
    )
    vmem_limit = int(min(64 * 1024 * 1024, vmem_bytes + 8 * 1024 * 1024))

    out = pl.pallas_call(
        kernel,
        out_shape=jax.ShapeDtypeStruct((Bp, Op), jnp.float32),
        grid_spec=pltpu.PrefetchScalarGridSpec(
            num_scalar_prefetch=0,
            grid=(num_chunks,),
            in_specs=[pl.BlockSpec((1, Tt * Bp, Fp), lambda k: (k, 0, 0))]
                     + [resident_spec(a) for a in weights],
            out_specs=pl.BlockSpec((Bp, Op), lambda k: (0, 0)),
            scratch_shapes=[
                pltpu.VMEM((Bp, Hp), jnp.float32),            # h carry
                pltpu.VMEM((Bp, Hp), jnp.float32),            # c carry
                pltpu.VMEM((Tt * Bp, 4 * Hp), jnp.float32),   # per-chunk x-projection
            ]),
        compiler_params=pltpu.CompilerParams(
            dimension_semantics=("arbitrary",),               # sequential recurrence
            vmem_limit_bytes=vmem_limit),
    )(x_chunks, *weights)
    return out[:B, :out_features]


def lstm_model_reference(x, params):
    """Pure-JAX reference of the PyTorch module: LSTM -> ReLU -> Linear -> [:, -1, :]."""
    w_ih, w_hh, b_ih, b_hh, w_fc, b_fc = (
        params[k] for k in ("w_ih", "w_hh", "b_ih", "b_hh", "w_fc", "b_fc"))
    B = x.shape[0]
    H = w_hh.shape[1]

    def step(carry, x_t):
        h, c = carry
        gates = x_t @ w_ih.T + b_ih + h @ w_hh.T + b_hh
        i = jax.nn.sigmoid(gates[:, 0 * H:1 * H])
        f = jax.nn.sigmoid(gates[:, 1 * H:2 * H])
        g = jnp.tanh(gates[:, 2 * H:3 * H])
        o = jax.nn.sigmoid(gates[:, 3 * H:4 * H])
        c = f * c + i * g
        h = o * jnp.tanh(c)
        return (h, c), None

    h0 = jnp.zeros((B, H), jnp.float32)
    c0 = jnp.zeros((B, H), jnp.float32)
    (h_T, _), _ = lax.scan(step, (h0, c0), jnp.transpose(x, (1, 0, 2)))
    return jnp.maximum(h_T, 0.0) @ w_fc.T + b_fc


def init_params(key, in_features, hidden_size, out_features):
    """Deterministic synthetic parameters (PyTorch-style uniform init)."""
    def u(k, shape, bound):
        return jax.random.uniform(k, shape, jnp.float32, -bound, bound)

    ks = jax.random.split(key, 6)
    bound = 1.0 / jnp.sqrt(jnp.float32(hidden_size))
    return dict(
        w_ih=u(ks[0], (4 * hidden_size, in_features), bound),
        w_hh=u(ks[1], (4 * hidden_size, hidden_size), bound),
        b_ih=u(ks[2], (4 * hidden_size,), bound),
        b_hh=u(ks[3], (4 * hidden_size,), bound),
        w_fc=u(ks[4], (out_features, hidden_size), bound),
        b_fc=u(ks[5], (out_features,), bound),
    )


if __name__ == "__main__":
    B, T = 2, 8
    in_features, hidden_size, out_features = 4, 32, 4

    key = jax.random.PRNGKey(0)
    kx, kp = jax.random.split(key)
    x = jax.random.normal(kx, (B, T, in_features), dtype=jnp.float32)
    params = init_params(kp, in_features, hidden_size, out_features)

    y_ref = lstm_model_reference(x, params)

    # 1) f32 compute, forced multi-chunk grid (time_chunk=3 -> 3 chunks, last
    #    timestep of the padded tail masked) -> exercises the h/c carry,
    #    pl.when init/head gating and tail masking.  Tight tolerance.
    y32 = jax.block_until_ready(
        lstm_model_forward(x, params, time_chunk=3, compute_dtype=jnp.float32))
    assert y32.shape == (B, out_features)
    assert bool(jnp.all(jnp.isfinite(y32)))
    assert bool(jnp.allclose(y32, y_ref, atol=1e-4, rtol=1e-4))

    # 2) Default path: bf16 matmul operands, f32 gate math / state.
    ybf = jax.block_until_ready(lstm_model_forward(x, params))
    assert ybf.shape == (B, out_features)
    assert bool(jnp.all(jnp.isfinite(ybf)))
    assert bool(jnp.allclose(ybf, y_ref, atol=5e-2, rtol=5e-2))

    print("KERNEL_OK")
</pallas_src>

<mosaic_0001>
module attributes {stable_mosaic.version = 11 : i64} {
  func.func @kernel(%arg0: i32, %arg1: memref<1x24x128xf32, #tpu.memory_space<vmem>>, %arg2: memref<128x512xf32, #tpu.memory_space<vmem>>, %arg3: memref<128x512xf32, #tpu.memory_space<vmem>>, %arg4: memref<1x512xf32, #tpu.memory_space<vmem>>, %arg5: memref<128x128xf32, #tpu.memory_space<vmem>>, %arg6: memref<1x128xf32, #tpu.memory_space<vmem>>, %arg7: memref<8x128xf32, #tpu.memory_space<vmem>>, %arg8: memref<8x128xf32, #tpu.memory_space<vmem>>, %arg9: memref<8x128xf32, #tpu.memory_space<vmem>>, %arg10: memref<24x512xf32, #tpu.memory_space<vmem>>) attributes {dimension_semantics = [#tpu.dimension_semantics<arbitrary>], iteration_bounds = array<i64: 3>, scalar_prefetch = 0 : i64, scratch_operands = 3 : i64, tpu.core_type = #tpu.core_type<tc>, window_params = [{transform_indices = @transform_0, window_bounds = array<i64: 1, 24, 128>}, {pipeline_mode = #tpu.pipeline_mode<synchronous>, transform_indices = @transform_1, window_bounds = array<i64: 128, 512>}, {pipeline_mode = #tpu.pipeline_mode<synchronous>, transform_indices = @transform_2, window_bounds = array<i64: 128, 512>}, {pipeline_mode = #tpu.pipeline_mode<synchronous>, transform_indices = @transform_3, window_bounds = array<i64: 1, 512>}, {pipeline_mode = #tpu.pipeline_mode<synchronous>, transform_indices = @transform_4, window_bounds = array<i64: 128, 128>}, {pipeline_mode = #tpu.pipeline_mode<synchronous>, transform_indices = @transform_5, window_bounds = array<i64: 1, 128>}, {pipeline_mode = #tpu.pipeline_mode<synchronous>, transform_indices = @transform_6, window_bounds = array<i64: 8, 128>}]} {
    %c0_i32 = arith.constant 0 : i32
    %0 = arith.cmpi eq, %arg0, %c0_i32 : i32
    %1 = arith.extui %0 : i1 to i32
    %c0_i32_0 = arith.constant 0 : i32
    %2 = arith.cmpi ne, %1, %c0_i32_0 : i32
    scf.if %2 {
      %cst_37 = arith.constant 0.000000e+00 : f32
      %98 = vector.broadcast %cst_37 : f32 to vector<8x128xf32>
      %c0_38 = arith.constant 0 : index
      %c0_39 = arith.constant 0 : index
      %99 = vector.load %arg8[%c0_38, %c0_39] : memref<8x128xf32, #tpu.memory_space<vmem>>, vector<8x128xf32>
      tpu.vector_store %arg8[%c0_38, %c0_39], %98 {strides = array<i32>} : memref<8x128xf32, #tpu.memory_space<vmem>>, vector<8x128xf32>,
      %cst_40 = arith.constant 0.000000e+00 : f32
      %100 = vector.broadcast %cst_40 : f32 to vector<8x128xf32>
      %c0_41 = arith.constant 0 : index
      %c0_42 = arith.constant 0 : index
      %101 = vector.load %arg9[%c0_41, %c0_42] : memref<8x128xf32, #tpu.memory_space<vmem>>, vector<8x128xf32>
      tpu.vector_store %arg9[%c0_41, %c0_42], %100 {strides = array<i32>} : memref<8x128xf32, #tpu.memory_space<vmem>>, vector<8x128xf32>,
    } else {
    }
    %c0 = arith.constant 0 : index
    %c0_1 = arith.constant 0 : index
    %c0_2 = arith.constant 0 : index
    %3 = vector.load %arg1[%c0, %c0_1, %c0_2] : memref<1x24x128xf32, #tpu.memory_space<vmem>>, vector<1x24x128xf32>
    %4 = vector.shape_cast %3 : vector<1x24x128xf32> to vector<24x128xf32>
    %c0_3 = arith.constant 0 : index
    %c0_4 = arith.constant 0 : index
    %5 = vector.load %arg2[%c0_3, %c0_4] : memref<128x512xf32, #tpu.memory_space<vmem>>, vector<128x512xf32>
    %cst = arith.constant dense<0.000000e+00> : vector<24x512xf32>
    %6 = tpu.matmul %4, %5, %cst {dimension_numbers = #tpu.dot_dimension_numbers<[1], [0], [0], [1], [0, 0, 1, 1], [], []>} : vector<24x128xf32>, vector<128x512xf32>, vector<24x512xf32> -> vector<24x512xf32>
    %c0_5 = arith.constant 0 : index
    %c0_6 = arith.constant 0 : index
    %7 = vector.load %arg4[%c0_5, %c0_6] : memref<1x512xf32, #tpu.memory_space<vmem>>, vector<1x512xf32>
    %8 = vector.broadcast %7 : vector<1x512xf32> to vector<24x512xf32>
    %9 = arith.addf %6, %8 : vector<24x512xf32>
    %c0_7 = arith.constant 0 : index
    %c0_8 = arith.constant 0 : index
    %10 = vector.load %arg10[%c0_7, %c0_8] : memref<24x512xf32, #tpu.memory_space<vmem>>, vector<24x512xf32>
    tpu.vector_store %arg10[%c0_7, %c0_8], %9 {strides = array<i32>} : memref<24x512xf32, #tpu.memory_space<vmem>>, vector<24x512xf32>,
    %c0_9 = arith.constant 0 : index
    %c0_10 = arith.constant 0 : index
    %11 = vector.load %arg3[%c0_9, %c0_10] : memref<128x512xf32, #tpu.memory_space<vmem>>, vector<128x512xf32>
    %c3_i32 = arith.constant 3 : i32
    %12 = arith.muli %arg0, %c3_i32 : i32
    %c0_11 = arith.constant 0 : index
    %c0_12 = arith.constant 0 : index
    %13 = vector.load %arg8[%c0_11, %c0_12] : memref<8x128xf32, #tpu.memory_space<vmem>>, vector<8x128xf32>
    %c0_13 = arith.constant 0 : index
    %c0_14 = arith.constant 0 : index
    %14 = vector.load %arg9[%c0_13, %c0_14] : memref<8x128xf32, #tpu.memory_space<vmem>>, vector<8x128xf32>
    %c0_i32_15 = arith.constant 0 : i32
    %c8_i32 = arith.constant 8 : i32
    %15 = arith.muli %c0_i32_15, %c8_i32 : i32
    %16 = tpu.assume_multiple %15, 8 : i32
    %17 = arith.index_cast %16 : i32 to index
    %c0_16 = arith.constant 0 : index
    %18 = vector.load %arg10[%17, %c0_16] : memref<24x512xf32, #tpu.memory_space<vmem>>, vector<8x512xf32>
    %cst_17 = arith.constant dense<0.000000e+00> : vector<8x512xf32>
    %19 = tpu.matmul %13, %11, %cst_17 {dimension_numbers = #tpu.dot_dimension_numbers<[1], [0], [0], [1], [0, 0, 1, 1], [], []>} : vector<8x128xf32>, vector<128x512xf32>, vector<8x512xf32> -> vector<8x512xf32>
    %20 = arith.addf %18, %19 : vector<8x512xf32>
    %21 = vector.extract_strided_slice %20 {offsets = [0, 0], sizes = [8, 384], strides = [1, 1]} : vector<8x512xf32> to vector<8x384xf32>
    %22 = arith.negf %21 : vector<8x384xf32>
    %23 = math.exp %22 : vector<8x384xf32>
    %cst_18 = arith.constant 1.000000e+00 : f32
    %24 = vector.broadcast %cst_18 : f32 to vector<8x384xf32>
    %25 = arith.addf %24, %23 : vector<8x384xf32>
    %26 = arith.divf %24, %25 : vector<8x384xf32>
    %27 = vector.extract_strided_slice %26 {offsets = [0, 0], sizes = [8, 128], strides = [1, 1]} : vector<8x384xf32> to vector<8x128xf32>
    %28 = vector.extract_strided_slice %26 {offsets = [0, 128], sizes = [8, 128], strides = [1, 1]} : vector<8x384xf32> to vector<8x128xf32>
    %29 = vector.extract_strided_slice %26 {offsets = [0, 256], sizes = [8, 128], strides = [1, 1]} : vector<8x384xf32> to vector<8x128xf32>
    %30 = vector.extract_strided_slice %20 {offsets = [0, 384], sizes = [8, 128], strides = [1, 1]} : vector<8x512xf32> to vector<8x128xf32>
    %31 = math.tanh %30 : vector<8x128xf32>
    %32 = arith.mulf %28, %14 : vector<8x128xf32>
    %33 = arith.mulf %27, %31 : vector<8x128xf32>
    %34 = arith.addf %32, %33 : vector<8x128xf32>
    %35 = math.tanh %34 : vector<8x128xf32>
    %36 = arith.mulf %29, %35 : vector<8x128xf32>
    %37 = arith.addi %12, %c0_i32_15 : i32
    %c8_i32_19 = arith.constant 8 : i32
    %38 = arith.cmpi slt, %37, %c8_i32_19 : i32
    %39 = arith.select %38, %36, %13 : vector<8x128xf32>
    %40 = arith.select %38, %34, %14 : vector<8x128xf32>
    %c1_i32 = arith.constant 1 : i32
    %c8_i32_20 = arith.constant 8 : i32
    %41 = arith.muli %c1_i32, %c8_i32_20 : i32
    %42 = tpu.assume_multiple %41, 8 : i32
    %43 = arith.index_cast %42 : i32 to index
    %c0_21 = arith.constant 0 : index
    %44 = vector.load %arg10[%43, %c0_21] : memref<24x512xf32, #tpu.memory_space<vmem>>, vector<8x512xf32>
    %cst_22 = arith.constant dense<0.000000e+00> : vector<8x512xf32>
    %45 = tpu.matmul %39, %11, %cst_22 {dimension_numbers = #tpu.dot_dimension_numbers<[1], [0], [0], [1], [0, 0, 1, 1], [], []>} : vector<8x128xf32>, vector<128x512xf32>, vector<8x512xf32> -> vector<8x512xf32>
    %46 = arith.addf %44, %45 : vector<8x512xf32>
    %47 = vector.extract_strided_slice %46 {offsets = [0, 0], sizes = [8, 384], strides = [1, 1]} : vector<8x512xf32> to vector<8x384xf32>
    %48 = arith.negf %47 : vector<8x384xf32>
    %49 = math.exp %48 : vector<8x384xf32>
    %cst_23 = arith.constant 1.000000e+00 : f32
    %50 = vector.broadcast %cst_23 : f32 to vector<8x384xf32>
    %51 = arith.addf %50, %49 : vector<8x384xf32>
    %52 = arith.divf %50, %51 : vector<8x384xf32>
    %53 = vector.extract_strided_slice %52 {offsets = [0, 0], sizes = [8, 128], strides = [1, 1]} : vector<8x384xf32> to vector<8x128xf32>
    %54 = vector.extract_strided_slice %52 {offsets = [0, 128], sizes = [8, 128], strides = [1, 1]} : vector<8x384xf32> to vector<8x128xf32>
    %55 = vector.extract_strided_slice %52 {offsets = [0, 256], sizes = [8, 128], strides = [1, 1]} : vector<8x384xf32> to vector<8x128xf32>
    %56 = vector.extract_strided_slice %46 {offsets = [0, 384], sizes = [8, 128], strides = [1, 1]} : vector<8x512xf32> to vector<8x128xf32>
    %57 = math.tanh %56 : vector<8x128xf32>
    %58 = arith.mulf %54, %40 : vector<8x128xf32>
    %59 = arith.mulf %53, %57 : vector<8x128xf32>
    %60 = arith.addf %58, %59 : vector<8x128xf32>
    %61 = math.tanh %60 : vector<8x128xf32>
    %62 = arith.mulf %55, %61 : vector<8x128xf32>
    %63 = arith.addi %12, %c1_i32 : i32
    %c8_i32_24 = arith.constant 8 : i32
    %64 = arith.cmpi slt, %63, %c8_i32_24 : i32
    %65 = arith.select %64, %62, %39 : vector<8x128xf32>
    %66 = arith.select %64, %60, %40 : vector<8x128xf32>
    %c2_i32 = arith.constant 2 : i32
    %c8_i32_25 = arith.constant 8 : i32
    %67 = arith.muli %c2_i32, %c8_i32_25 : i32
    %68 = tpu.assume_multiple %67, 8 : i32
    %69 = arith.index_cast %68 : i32 to index
    %c0_26 = arith.constant 0 : index
    %70 = vector.load %arg10[%69, %c0_26] : memref<24x512xf32, #tpu.memory_space<vmem>>, vector<8x512xf32>
    %cst_27 = arith.constant dense<0.000000e+00> : vector<8x512xf32>
    %71 = tpu.matmul %65, %11, %cst_27 {dimension_numbers = #tpu.dot_dimension_numbers<[1], [0], [0], [1], [0, 0, 1, 1], [], []>} : vector<8x128xf32>, vector<128x512xf32>, vector<8x512xf32> -> vector<8x512xf32>
    %72 = arith.addf %70, %71 : vector<8x512xf32>
    %73 = vector.extract_strided_slice %72 {offsets = [0, 0], sizes = [8, 384], strides = [1, 1]} : vector<8x512xf32> to vector<8x384xf32>
    %74 = arith.negf %73 : vector<8x384xf32>
    %75 = math.exp %74 : vector<8x384xf32>
    %cst_28 = arith.constant 1.000000e+00 : f32
    %76 = vector.broadcast %cst_28 : f32 to vector<8x384xf32>
    %77 = arith.addf %76, %75 : vector<8x384xf32>
    %78 = arith.divf %76, %77 : vector<8x384xf32>
    %79 = vector.extract_strided_slice %78 {offsets = [0, 0], sizes = [8, 128], strides = [1, 1]} : vector<8x384xf32> to vector<8x128xf32>
    %80 = vector.extract_strided_slice %78 {offsets = [0, 128], sizes = [8, 128], strides = [1, 1]} : vector<8x384xf32> to vector<8x128xf32>
    %81 = vector.extract_strided_slice %78 {offsets = [0, 256], sizes = [8, 128], strides = [1, 1]} : vector<8x384xf32> to vector<8x128xf32>
    %82 = vector.extract_strided_slice %72 {offsets = [0, 384], sizes = [8, 128], strides = [1, 1]} : vector<8x512xf32> to vector<8x128xf32>
    %83 = math.tanh %82 : vector<8x128xf32>
    %84 = arith.mulf %80, %66 : vector<8x128xf32>
    %85 = arith.mulf %79, %83 : vector<8x128xf32>
    %86 = arith.addf %84, %85 : vector<8x128xf32>
    %87 = math.tanh %86 : vector<8x128xf32>
    %88 = arith.mulf %81, %87 : vector<8x128xf32>
    %89 = arith.addi %12, %c2_i32 : i32
    %c8_i32_29 = arith.constant 8 : i32
    %90 = arith.cmpi slt, %89, %c8_i32_29 : i32
    %91 = arith.select %90, %88, %65 : vector<8x128xf32>
    %92 = arith.select %90, %86, %66 : vector<8x128xf32>
    %c3_i32_30 = arith.constant 3 : i32
    %c0_31 = arith.constant 0 : index
    %c0_32 = arith.constant 0 : index
    %93 = vector.load %arg8[%c0_31, %c0_32] : memref<8x128xf32, #tpu.memory_space<vmem>>, vector<8x128xf32>
    tpu.vector_store %arg8[%c0_31, %c0_32], %91 {strides = array<i32>} : memref<8x128xf32, #tpu.memory_space<vmem>>, vector<8x128xf32>,
    %c0_33 = arith.constant 0 : index
    %c0_34 = arith.constant 0 : index
    %94 = vector.load %arg9[%c0_33, %c0_34] : memref<8x128xf32, #tpu.memory_space<vmem>>, vector<8x128xf32>
    tpu.vector_store %arg9[%c0_33, %c0_34], %92 {strides = array<i32>} : memref<8x128xf32, #tpu.memory_space<vmem>>, vector<8x128xf32>,
    %c2_i32_35 = arith.constant 2 : i32
    %95 = arith.cmpi eq, %arg0, %c2_i32_35 : i32
    %96 = arith.extui %95 : i1 to i32
    %c0_i32_36 = arith.constant 0 : i32
    %97 = arith.cmpi ne, %96, %c0_i32_36 : i32
    scf.if %97 {
      %c0_37 = arith.constant 0 : index
      %c0_38 = arith.constant 0 : index
      %98 = vector.load %arg5[%c0_37, %c0_38] : memref<128x128xf32, #tpu.memory_space<vmem>>, vector<128x128xf32>
      %cst_39 = arith.constant 0.000000e+00 : f32
      %99 = vector.broadcast %cst_39 : f32 to vector<8x128xf32>
      %100 = arith.maximumf %91, %99 : vector<8x128xf32>
      %cst_40 = arith.constant dense<0.000000e+00> : vector<8x128xf32>
      %101 = tpu.matmul %100, %98, %cst_40 {dimension_numbers = #tpu.dot_dimension_numbers<[1], [0], [0], [1], [0, 0, 1, 1], [], []>} : vector<8x128xf32>, vector<128x128xf32>, vector<8x128xf32> -> vector<8x128xf32>
      %c0_41 = arith.constant 0 : index
      %c0_42 = arith.constant 0 : index
      %102 = vector.load %arg6[%c0_41, %c0_42] : memref<1x128xf32, #tpu.memory_space<vmem>>, vector<1x128xf32>
      %103 = vector.broadcast %102 : vector<1x128xf32> to vector<8x128xf32>
      %104 = arith.addf %101, %103 : vector<8x128xf32>
      %c0_43 = arith.constant 0 : index
      %c0_44 = arith.constant 0 : index
      %105 = vector.load %arg7[%c0_43, %c0_44] : memref<8x128xf32, #tpu.memory_space<vmem>>, vector<8x128xf32>
      tpu.vector_store %arg7[%c0_43, %c0_44], %104 {strides = array<i32>} : memref<8x128xf32, #tpu.memory_space<vmem>>, vector<8x128xf32>,
    } else {
    }
    return
  }
  func.func @transform_0(%arg0: i32) -> (i32, i32, i32) {
    %c0_i32 = arith.constant 0 : i32
    %c0_i32_0 = arith.constant 0 : i32
    %c0_i32_1 = arith.constant 0 : i32
    return %arg0, %c0_i32, %c0_i32_0 : i32, i32, i32
  }
  func.func @transform_1(%arg0: i32) -> (i32, i32) {
    %c0_i32 = arith.constant 0 : i32
    %c0_i32_0 = arith.constant 0 : i32
    %c0_i32_1 = arith.constant 0 : i32
    return %c0_i32, %c0_i32_0 : i32, i32
  }
  func.func @transform_2(%arg0: i32) -> (i32, i32) {
    %c0_i32 = arith.constant 0 : i32
    %c0_i32_0 = arith.constant 0 : i32
    %c0_i32_1 = arith.constant 0 : i32
    return %c0_i32, %c0_i32_0 : i32, i32
  }
  func.func @transform_3(%arg0: i32) -> (i32, i32) {
    %c0_i32 = arith.constant 0 : i32
    %c0_i32_0 = arith.constant 0 : i32
    %c0_i32_1 = arith.constant 0 : i32
    return %c0_i32, %c0_i32_0 : i32, i32
  }
  func.func @transform_4(%arg0: i32) -> (i32, i32) {
    %c0_i32 = arith.constant 0 : i32
    %c0_i32_0 = arith.constant 0 : i32
    %c0_i32_1 = arith.constant 0 : i32
    return %c0_i32, %c0_i32_0 : i32, i32
  }
  func.func @transform_5(%arg0: i32) -> (i32, i32) {
    %c0_i32 = arith.constant 0 : i32
    %c0_i32_0 = arith.constant 0 : i32
    %c0_i32_1 = arith.constant 0 : i32
    return %c0_i32, %c0_i32_0 : i32, i32
  }
  func.func @transform_6(%arg0: i32) -> (i32, i32) {
    %c0_i32 = arith.constant 0 : i32
    %c0_i32_0 = arith.constant 0 : i32
    %c0_i32_1 = arith.constant 0 : i32
    return %c0_i32, %c0_i32_0 : i32, i32
  }
}

</mosaic_0001>

<bundles_post_ra>
// kernel: tpu_custom_call.1
= control target key start
LH: loop header
LB: loop body
LE: loop exit
PB: predicated region body
PF: predicated region fallthrough
CT: control target
= control target key end

     0   :  { %11 = vsyncpa [#allocation6], 0  ;;  %s2210_s0 = inlined_call_operand.hbm [shape: f32[3,24,128], index: 0, kind: input, shape index: {}]   ;;  %s2211_s1 = inlined_call_operand.hbm [shape: f32[128,512], index: 1, kind: input, shape index: {}]   ;;  %s2212_s2 = inlined_call_operand.hbm [shape: f32[128,512], index: 2, kind: input, shape index: {}]   ;;  %s2213_s3 = inlined_call_operand.hbm [shape: f32[1,512], index: 3, kind: input, shape index: {}]   ;;  %s2214_s4 = inlined_call_operand.hbm [shape: f32[128,128], index: 4, kind: input, shape index: {}]   ;;  %s2215_s5 = inlined_call_operand.vmem [shape: f32[1,128], index: 5, kind: input, shape index: {}]   ;;  %s2216_s6 = inlined_call_operand.hbm [shape: f32[8,128], index: 6, kind: output, shape index: {}]  }
   0x1   :  { %13 = vsyncpa [#allocation6 + $0x1], 0 }
   0x2   :  { %14 = vsyncpa [#allocation9], 0 }
   0x3   :  { %15 = vsyncpa [#allocation12], 0 }
   0x4   :  { %16 = vsyncpa [#allocation7], 0  ;;  %s1662_s21 = smov 0   ;;  %s1664_s22 = smov 0  }
   0x5   :  { %s1666_s23 = smov 0   ;;  %s1668_s24 = smov 0  }
   0x6 LB: > { %s1681_s25 = sadd.s32 4294967295, %s1615_s24   ;;  %p42_p0 = scmp.ne.s32.totalorder %s1607_s22, %s1603_s21  ;;  %s1615_s24 = sphi %s1668_s24, %s2235_s24   ;;  %s1611_s23 = sphi %s1666_s23, %s2234_s23   ;;  %s1607_s22 = sphi %s1664_s22, %s2233_s22   ;;  %s1603_s21 = sphi %s1662_s21, %s2232_s21  }
   0x7   : > { %p43_p1 = scmp.eq.s32.totalorder %s1681_s25, 0  ;;  %p1220_p2 = scmp.ge.s32.totalorder %s1615_s24, 1 }
   0x8   : > { %p179_p3 = scmp.lt.s32.totalorder %s1615_s24, 4  ;;  %p1221_p4 = scmp.ne.s32.totalorder %s1681_s25, 0 }
   0x9   : > { %p1690_p5 = por %p43_p1, %p42_p0  ;;  %s190_s29 = sshll.u32 %s2211_s1, 4  ;;  %s191_s29 = int_to_ptr.hbm [resolvable:$true] %s190_s29 }
   0xa   : > { %p1697_p6 = pnand %p1220_p2, %p179_p3  ;;  %s1617_s7 = smov [#allocation8]  }
   0xb   : > { %s192_s8 = sshll.u32 %s1617_s7, 4  ;;  %s219_s12 = sshll.u32 %s2213_s3, 4  ;;  %s193_s8 = int_to_ptr.vmem [resolvable:$true] %s192_s8  ;;  %s220_s12 = int_to_ptr.hbm [resolvable:$true] %s219_s12 }
   0xc   : > { %p1272_p7 = pneg %p1697_p6  ;;  %s1618_s13 = smov 512  }
   0xd   : > { %s1619_s14 = smov 32   ;;  %s1620_s15 = smov [#allocation11]  }
   0xe   : > { %p1705_p8 = pnand %p1272_p7, %p43_p1  ;;  %s221_s16 = sshll.u32 %s1620_s15, 4  ;;  %s222_s16 = int_to_ptr.vmem [resolvable:$true] %s221_s16 }
   0xf   : > { %s204_s19 = sshll.u32 %s2212_s2, 4  ;;  %s230_s27 = sshll.u32 %s2214_s4, 4  ;;  %s205_s19 = int_to_ptr.hbm [resolvable:$true] %s204_s19  ;;  %s231_s27 = int_to_ptr.hbm [resolvable:$true] %s230_s27 }
  0x10   : > { %1275 = dma.hbm_to_vmem [thread:$0]  (!%p1705_p8), %s191_s29, 8192, %s193_s8, [#allocation9], %s1618_s13, %s1618_s13, %s1619_s14  }
  0x11   : > { %1281 = dma.hbm_to_vmem [thread:$0]  (!%p1705_p8), %s220_s12, 64, %s222_s16, [#allocation12]  }
  0x12   : > { %s1621_s28 = smov [#allocation10]   ;;  %s1622_s7 = smov [#allocation13]  }
  0x13   : > { %s206_s29 = sshll.u32 %s1621_s28, 4  ;;  %s232_s8 = sshll.u32 %s1622_s7, 4  ;;  %s207_s29 = int_to_ptr.vmem [resolvable:$true] %s206_s29  ;;  %s233_s8 = int_to_ptr.vmem [resolvable:$true] %s232_s8 }
  0x14   : > { %1278 = dma.hbm_to_vmem [thread:$0]  (!%p1705_p8), %s205_s19, 8192, %s207_s29, [#allocation9], %s1618_s13, %s1618_s13, %s1619_s14  }
  0x15   : > { %s1623_s10 = smov 128   ;;  %s1624_s11 = smov 8  }
  0x16   : > { %1284 = dma.hbm_to_vmem [thread:$0]  (!%p1705_p8), %s231_s27, 2048, %s233_s8, [#allocation12], %s1623_s10, %s1623_s10, %s1624_s11  }
  0x17   : > { %s1730_s12 = sadd.s32 1, %s1615_s24   ;;  %s29_s16 = sadd.s32 1, %s1611_s23 }
  0x18   : > { %s26_s15 = ssub.s32 %s1615_s24, %s1730_s12  ;;  %p36_p10 = scmp.ne.s32.totalorder %s1611_s23, %s1607_s22 }
  0x19   : > { %p27_p9 = scmp.eq.s32.totalorder %s26_s15, 0  ;;  %p37_p11 = scmp.eq.s32.totalorder %s1615_s24, 0 }
  0x1a   : > { %p1293_p13 = scmp.lt.s32.totalorder %s1615_s24, 3  ;;  %s249_s14 = sand.u32 1, %s1611_s23  }
  0x1b   : > { %s1739_s13 = scalar_select %p27_p9, %s1611_s23, %s29_s16  }
  0x1c   : > { %p38_p12 = por %p37_p11, %p36_p10  ;;  %s1248_s17 = smul.u32 24, %s1615_s24 }
  0x1d   : > { %s1247_s18 = smul.u32 24, %s249_s14  ;;  %s250_s7 = scalar_lea.sflag [#allocation6], %s249_s14 }
  0x1e   : > { %s258_s20 = scalar_lea.hbm %s2210_s0, %s1248_s17  ;;  %p1747_p0 = pnand %p1293_p13, %p38_p12 }
  0x1f   : > { %s259_s27 = sshll.u32 %s258_s20, 4  ;;  %s253_s28 = scalar_lea.vmem [#allocation5], %s1247_s18  ;;  %s260_s27 = int_to_ptr.hbm [resolvable:$true] %s259_s27 }
  0x20   : > { %s261_s29 = sshll.u32 %s253_s28, 4  ;;  %s1511_s8 = sshra.s32 %s260_s27, 4  ;;  %s262_s29 = int_to_ptr.vmem [resolvable:$true] %s261_s29  ;;  %s1512_s8 = int_to_ptr.hbm [resolvable:$true] %s1511_s8 }
  0x21   : > { %s1513_s15 = scalar_lea.hbm %s1512_s8, 24  ;;  %p1515_p3 = pneg %p1747_p0 }
  0x22   : > { %p1514_p2 = scmp.ne.s32.totalorder %s1512_s8, %s1513_s15  ;;  %s1518_s17 = scalar_lea.hbm %s2210_s0, 72 }
  0x23   : > { %p1519_p9 = scmp.lt.s32.totalorder %s1512_s8, %s2210_s0  ;;  %p1520_p10 = scmp.lt.s32.totalorder %s1518_s17, %s1513_s15 }
  0x24   : > { %p1516_p7 = pnand %p1515_p3, %p1514_p2 }
  0x25   : > { %p1521_p11 = por %p1520_p10, %p1519_p9 }
  0x26   : > { %p1517_p8 = pneg %p1516_p7 }
  0x28   : > { %p1522_p12 = pnand %p1521_p11, %p1517_p8 }
  0x2a   : > { %1525 = shalt.err (!%p1522_p12)
}
  0x2b   : > { %1288 = dma.hbm_to_vmem [thread:$0]  (!%p1747_p0), %s260_s27, 384, %s262_s29, %s250_s7, %s1623_s10, %s1623_s10, %s1624_s11  }
  0x2c   : > { %273 = sbr.rel (%p1697_p6) target bundleno = 817 (0x331), region = 44 }
  0x31   : > { %s275_s14 = sand.u32 1, %s1607_s22  }
  0x32   : > { %s1249_s18 = smul.u32 24, %s275_s14  ;;  %s276_s20 = scalar_lea.sflag [#allocation6], %s275_s14 }
  0x34   : > { %s1767_s28 = scalar_lea.vmem [#allocation5], %s1249_s18 }
  0x35   : > { %1586 = dma.done.wait (%p1690_p5), %s276_s20, 384  }
  0x36   : > { %1588 = vsyncadd (%p1690_p5), %s276_s20, 4294966912 }
  0x37   : > { %1590 = dma.done.wait (%p43_p1), [#allocation9], 16384  }
  0x38   : > { %1592 = vsyncadd (%p43_p1), [#allocation9], 4294950912 }
  0x39   : > { %1594 = dma.done.wait (%p43_p1), [#allocation12], 2112  }
  0x3a   : > { %1596 = vsyncadd (%p43_p1), [#allocation12], 4294965184  ;;  %327 = sbr.rel (%p1221_p4) target bundleno = 66 (0x42), region = 68 }
  0x3f   : > { %v1625_v0 = vmov 0.0  }
  0x40   : > { %328 = vst [vmem:[#allocation2] sm:$0xff] %v1625_v0 }
  0x41   : > { %329 = vst [vmem:[#allocation3] sm:$0xff] %v1625_v0 }
  0x42 PF: > { %v393_v1 = vld [vmem:[#allocation8 + $0x1e0] sm:$0xff]  ;;  %v394_v2 = vld [vmem:[#allocation8 + $0x1e8] sm:$0xff]  ;;  %v395_v3 = vld [vmem:[#allocation8 + $0x1f0] sm:$0xff]  ;;  %s2129_s26 = smul.u32 3, %s1681_s25  ;;  %p1242_p6 = scmp.ne.s32.totalorder %s1681_s25, 2 }
  0x43   : > { %407 = vmatpush.msra.mxu0 %v393_v1  ;;  %433 = vmatpush.msra.mxu1 %v394_v2  ;;  %v396_v4 = vld [vmem:[#allocation8 + $0x1f8] sm:$0xff]  ;;  %v389_v5 = vld [vmem:[#allocation8 + $0x1c0] sm:$0xff]  ;;  %v390_v6 = vld [vmem:[#allocation8 + $0x1c8] sm:$0xff] }
  0x44   : > { %459 = vmatpush.msra.mxu2 %v395_v3  ;;  %485 = vmatpush.msra.mxu3 %v396_v4  ;;  %v391_v7 = vld [vmem:[#allocation8 + $0x1d0] sm:$0xff]  ;;  %v392_v8 = vld [vmem:[#allocation8 + $0x1d8] sm:$0xff]  ;;  %v385_v9 = vld [vmem:[#allocation8 + $0x1a0] sm:$0xff]  ;;  %p744_p1 = scmp.lt.s32.totalorder %s2129_s26, 8  ;;  %s904_s10 = sadd.s32 1, %s2129_s26 }
  0x45   : > { %408 = vmatpush.msra.mxu0 %v389_v5  ;;  %434 = vmatpush.msra.mxu1 %v390_v6  ;;  %v386_v10 = vld [vmem:[#allocation8 + $0x1a8] sm:$0xff]  ;;  %v387_v11 = vld [vmem:[#allocation8 + $0x1b0] sm:$0xff]  ;;  %v388_v12 = vld [vmem:[#allocation8 + $0x1b8] sm:$0xff]  ;;  %p2154_p4 = scmp.lt.s32.totalorder %s904_s10, 8  ;;  %s1065_s27 = sadd.s32 2, %s2129_s26 }
  0x46   : > { %460 = vmatpush.msra.mxu2 %v391_v7  ;;  %486 = vmatpush.msra.mxu3 %v392_v8  ;;  %v381_v13 = vld [vmem:[#allocation8 + $0x180] sm:$0xff]  ;;  %v382_v14 = vld [vmem:[#allocation8 + $0x188] sm:$0xff]  ;;  %v383_v15 = vld [vmem:[#allocation8 + $0x190] sm:$0xff]  ;;  %s745_s30 = scalar_select %p744_p1, 1, 0 }
  0x47   : > { %409 = vmatpush.msra.mxu0 %v385_v9  ;;  %435 = vmatpush.msra.mxu1 %v386_v10  ;;  %v384_v16 = vld [vmem:[#allocation8 + $0x198] sm:$0xff]  ;;  %v377_v17 = vld [vmem:[#allocation8 + $0x160] sm:$0xff]  ;;  %v378_v18 = vld [vmem:[#allocation8 + $0x168] sm:$0xff]  ;;  %s906_s21 = scalar_select %p2154_p4, 1, 0 }
  0x48   : > { %461 = vmatpush.msra.mxu2 %v387_v11  ;;  %487 = vmatpush.msra.mxu3 %v388_v12  ;;  %v379_v19 = vld [vmem:[#allocation8 + $0x170] sm:$0xff]  ;;  %v380_v20 = vld [vmem:[#allocation8 + $0x178] sm:$0xff]  ;;  %v373_v21 = vld [vmem:[#allocation8 + $0x140] sm:$0xff]  ;;  %p2178_p5 = scmp.lt.s32.totalorder %s1065_s27, 8 }
  0x49   : > { %410 = vmatpush.msra.mxu0 %v381_v13  ;;  %436 = vmatpush.msra.mxu1 %v382_v14  ;;  %v374_v22 = vld [vmem:[#allocation8 + $0x148] sm:$0xff]  ;;  %v375_v23 = vld [vmem:[#allocation8 + $0x150] sm:$0xff]  ;;  %v376_v24 = vld [vmem:[#allocation8 + $0x158] sm:$0xff] }
  0x4a   : > { %462 = vmatpush.msra.mxu2 %v383_v15  ;;  %488 = vmatpush.msra.mxu3 %v384_v16  ;;  %v369_v25 = vld [vmem:[#allocation8 + $0x120] sm:$0xff]  ;;  %v370_v26 = vld [vmem:[#allocation8 + $0x128] sm:$0xff]  ;;  %v371_v27 = vld [vmem:[#allocation8 + $0x130] sm:$0xff]  ;;  %s1067_s7 = scalar_select %p2178_p5, 1, 0 }
  0x4b   : > { %411 = vmatpush.msra.mxu0 %v377_v17  ;;  %437 = vmatpush.msra.mxu1 %v378_v18  ;;  %v372_v28 = vld [vmem:[#allocation8 + $0x138] sm:$0xff]  ;;  %v365_v29 = vld [vmem:[#allocation8 + $0x100] sm:$0xff]  ;;  %v366_v30 = vld [vmem:[#allocation8 + $0x108] sm:$0xff] }
  0x4c   : > { %463 = vmatpush.msra.mxu2 %v379_v19  ;;  %489 = vmatpush.msra.mxu3 %v380_v20  ;;  %v367_v31 = vld [vmem:[#allocation8 + $0x110] sm:$0xff]  ;;  %v368_v32 = vld [vmem:[#allocation8 + $0x118] sm:$0xff]  ;;  %v361_v33 = vld [vmem:[#allocation8 + $0xe0] sm:$0xff] }
  0x4d   : > { %412 = vmatpush.msra.mxu0 %v373_v21  ;;  %438 = vmatpush.msra.mxu1 %v374_v22  ;;  %v362_v34 = vld [vmem:[#allocation8 + $0xe8] sm:$0xff]  ;;  %v363_v35 = vld [vmem:[#allocation8 + $0xf0] sm:$0xff]  ;;  %v364_v36 = vld [vmem:[#allocation8 + $0xf8] sm:$0xff] }
  0x4e   : > { %464 = vmatpush.msra.mxu2 %v375_v23  ;;  %490 = vmatpush.msra.mxu3 %v376_v24  ;;  %v357_v37 = vld [vmem:[#allocation8 + $0xc0] sm:$0xff]  ;;  %v358_v38 = vld [vmem:[#allocation8 + $0xc8] sm:$0xff]  ;;  %v359_v39 = vld [vmem:[#allocation8 + $0xd0] sm:$0xff] }
  0x4f   : > { %413 = vmatpush.msra.mxu0 %v369_v25  ;;  %439 = vmatpush.msra.mxu1 %v370_v26  ;;  %v360_v40 = vld [vmem:[#allocation8 + $0xd8] sm:$0xff]  ;;  %v353_v41 = vld [vmem:[#allocation8 + $0xa0] sm:$0xff]  ;;  %v354_v42 = vld [vmem:[#allocation8 + $0xa8] sm:$0xff] }
  0x50   : > { %465 = vmatpush.msra.mxu2 %v371_v27  ;;  %491 = vmatpush.msra.mxu3 %v372_v28  ;;  %v355_v43 = vld [vmem:[#allocation8 + $0xb0] sm:$0xff]  ;;  %v356_v44 = vld [vmem:[#allocation8 + $0xb8] sm:$0xff]  ;;  %v349_v45 = vld [vmem:[#allocation8 + $0x80] sm:$0xff] }
  0x51   : > { %414 = vmatpush.msra.mxu0 %v365_v29  ;;  %440 = vmatpush.msra.mxu1 %v366_v30  ;;  %v350_v46 = vld [vmem:[#allocation8 + $0x88] sm:$0xff]  ;;  %v351_v47 = vld [vmem:[#allocation8 + $0x90] sm:$0xff]  ;;  %v352_v48 = vld [vmem:[#allocation8 + $0x98] sm:$0xff] }
  0x52   : > { %466 = vmatpush.msra.mxu2 %v367_v31  ;;  %492 = vmatpush.msra.mxu3 %v368_v32  ;;  %v345_v49 = vld [vmem:[#allocation8 + $0x60] sm:$0xff]  ;;  %v346_v50 = vld [vmem:[#allocation8 + $0x68] sm:$0xff]  ;;  %v347_v51 = vld [vmem:[#allocation8 + $0x70] sm:$0xff] }
  0x53   : > { %415 = vmatpush.msra.mxu0 %v361_v33  ;;  %441 = vmatpush.msra.mxu1 %v362_v34  ;;  %v348_v52 = vld [vmem:[#allocation8 + $0x78] sm:$0xff]  ;;  %v341_v53 = vld [vmem:[#allocation8 + $0x40] sm:$0xff]  ;;  %v342_v54 = vld [vmem:[#allocation8 + $0x48] sm:$0xff] }
  0x54   : > { %467 = vmatpush.msra.mxu2 %v363_v35  ;;  %493 = vmatpush.msra.mxu3 %v364_v36  ;;  %v343_v55 = vld [vmem:[#allocation8 + $0x50] sm:$0xff]  ;;  %v344_v56 = vld [vmem:[#allocation8 + $0x58] sm:$0xff]  ;;  %v337_v57 = vld [vmem:[#allocation8 + $0x20] sm:$0xff] }
  0x55   : > { %416 = vmatpush.msra.mxu0 %v357_v37  ;;  %442 = vmatpush.msra.mxu1 %v358_v38  ;;  %v338_v58 = vld [vmem:[#allocation8 + $0x28] sm:$0xff]  ;;  %v339_v59 = vld [vmem:[#allocation8 + $0x30] sm:$0xff]  ;;  %v340_v60 = vld [vmem:[#allocation8 + $0x38] sm:$0xff] }
  0x56   : > { %468 = vmatpush.msra.mxu2 %v359_v39  ;;  %494 = vmatpush.msra.mxu3 %v360_v40  ;;  %v333_v61 = vld [vmem:[#allocation8] sm:$0xff]  ;;  %v334_v62 = vld [vmem:[#allocation8 + $0x8] sm:$0xff]  ;;  %v335_v63 = vld [vmem:[#allocation8 + $0x10] sm:$0xff] }
  0x57   : > { %417 = vmatpush.msra.mxu0 %v353_v41  ;;  %443 = vmatpush.msra.mxu1 %v354_v42  ;;  %v336_v0 = vld [vmem:[#allocation8 + $0x18] sm:$0xff]  ;;  %v1783_v1 = vld [vmem:[#allocation10 + $0x1e0] sm:$0xff]  ;;  %v1785_v2 = vld [vmem:[#allocation10 + $0x1e8] sm:$0xff] }
  0x58   : > { %469 = vmatpush.msra.mxu2 %v355_v43  ;;  %495 = vmatpush.msra.mxu3 %v356_v44  ;;  %v1787_v3 = vld [vmem:[#allocation10 + $0x1f0] sm:$0xff]  ;;  %v1789_v4 = vld [vmem:[#allocation10 + $0x1f8] sm:$0xff]  ;;  %v1791_v5 = vld [vmem:[#allocation10 + $0x1c0] sm:$0xff] }
  0x59   : > { %418 = vmatpush.msra.mxu0 %v349_v45  ;;  %444 = vmatpush.msra.mxu1 %v350_v46  ;;  %v1793_v6 = vld [vmem:[#allocation10 + $0x1c8] sm:$0xff]  ;;  %v1797_v7 = vld [vmem:[#allocation10 + $0x1d0] sm:$0xff]  ;;  %v1799_v8 = vld [vmem:[#allocation10 + $0x1d8] sm:$0xff] }
  0x5a   : > { %470 = vmatpush.msra.mxu2 %v351_v47  ;;  %496 = vmatpush.msra.mxu3 %v352_v48  ;;  %v1803_v9 = vld [vmem:[#allocation10 + $0x1a0] sm:$0xff]  ;;  %v1805_v10 = vld [vmem:[#allocation10 + $0x1a8] sm:$0xff]  ;;  %v1809_v11 = vld [vmem:[#allocation10 + $0x1b0] sm:$0xff] }
  0x5b   : > { %419 = vmatpush.msra.mxu0 %v345_v49  ;;  %445 = vmatpush.msra.mxu1 %v346_v50  ;;  %v1811_v12 = vld [vmem:[#allocation10 + $0x1b8] sm:$0xff]  ;;  %v1815_v13 = vld [vmem:[#allocation10 + $0x180] sm:$0xff]  ;;  %v1817_v14 = vld [vmem:[#allocation10 + $0x188] sm:$0xff] }
  0x5c   : > { %471 = vmatpush.msra.mxu2 %v347_v51  ;;  %497 = vmatpush.msra.mxu3 %v348_v52  ;;  %v1821_v15 = vld [vmem:[#allocation10 + $0x190] sm:$0xff]  ;;  %v1823_v16 = vld [vmem:[#allocation10 + $0x198] sm:$0xff]  ;;  %v1832_v18 = vld [vmem:[#allocation10 + $0x160] sm:$0xff] }
  0x5d   : > { %420 = vmatpush.msra.mxu0 %v341_v53  ;;  %446 = vmatpush.msra.mxu1 %v342_v54  ;;  %v330_v17 = vld [vmem:[%s1767_s28] sm:$0xff]  ;;  %v1838_v21 = vld [vmem:[#allocation10 + $0x178] sm:$0xff]  ;;  %v1840_v22 = vld [vmem:[#allocation10 + $0x140] sm:$0xff] }
  0x5e   : > { %472 = vmatpush.msra.mxu2 %v343_v55  ;;  %498 = vmatpush.msra.mxu3 %v344_v56  ;;  %v1834_v19 = vld [vmem:[#allocation10 + $0x168] sm:$0xff]  ;;  %v1836_v20 = vld [vmem:[#allocation10 + $0x170] sm:$0xff]  ;;  %v1848_v25 = vld [vmem:[#allocation10 + $0x158] sm:$0xff] }
  0x5f   : > { %421 = vmatpush.msra.mxu0 %v337_v57  ;;  %447 = vmatpush.msra.mxu1 %v338_v58  ;;  %v1842_v23 = vld [vmem:[#allocation10 + $0x148] sm:$0xff]  ;;  %v1846_v24 = vld [vmem:[#allocation10 + $0x150] sm:$0xff]  ;;  %v1852_v26 = vld [vmem:[#allocation10 + $0x120] sm:$0xff] }
  0x60   : > { %473 = vmatpush.msra.mxu2 %v339_v59  ;;  %499 = vmatpush.msra.mxu3 %v340_v60  ;;  %v1854_v27 = vld [vmem:[#allocation10 + $0x128] sm:$0xff]  ;;  %v1858_v28 = vld [vmem:[#allocation10 + $0x130] sm:$0xff]  ;;  %v1860_v29 = vld [vmem:[#allocation10 + $0x138] sm:$0xff] }
  0x61   : > { %422 = vmatpush.msra.mxu0 %v333_v61  ;;  %448 = vmatpush.msra.mxu1 %v334_v62  ;;  %v1864_v30 = vld [vmem:[#allocation10 + $0x100] sm:$0xff]  ;;  %v1866_v31 = vld [vmem:[#allocation10 + $0x108] sm:$0xff]  ;;  %v1870_v32 = vld [vmem:[#allocation10 + $0x110] sm:$0xff] }
  0x62   : > { %474 = vmatpush.msra.mxu2 %v335_v63  ;;  %500 = vmatpush.msra.mxu3 %v336_v0  ;;  %v1872_v33 = vld [vmem:[#allocation10 + $0x118] sm:$0xff]  ;;  %v1881_v35 = vld [vmem:[#allocation10 + $0xe0] sm:$0xff]  ;;  %v1883_v36 = vld [vmem:[#allocation10 + $0xe8] sm:$0xff] }
  0x63   : > { %597 = vmatpush.msrb.mxu0 %v1783_v1  ;;  %617 = vmatpush.msrb.mxu1 %v1785_v2  ;;  %v331_v34 = vld [vmem:[%s1767_s28 + $0x8] sm:$0xff]  ;;  %v1889_v39 = vld [vmem:[#allocation10 + $0xc0] sm:$0xff]  ;;  %v1891_v40 = vld [vmem:[#allocation10 + $0xc8] sm:$0xff] }
  0x64   : > { %637 = vmatpush.msrb.mxu2 %v1787_v3  ;;  %657 = vmatpush.msrb.mxu3 %v1789_v4  ;;  %v1885_v37 = vld [vmem:[#allocation10 + $0xf0] sm:$0xff]  ;;  %v1887_v38 = vld [vmem:[#allocation10 + $0xf8] sm:$0xff]  ;;  %v1901_v43 = vld [vmem:[#allocation10 + $0xa0] sm:$0xff] }
  0x65   : > { %598 = vmatpush.msrb.mxu0 %v1791_v5  ;;  %618 = vmatpush.msrb.mxu1 %v1793_v6  ;;  %v1895_v41 = vld [vmem:[#allocation10 + $0xd0] sm:$0xff]  ;;  %v1897_v42 = vld [vmem:[#allocation10 + $0xd8] sm:$0xff]  ;;  %v1903_v44 = vld [vmem:[#allocation10 + $0xa8] sm:$0xff] }
  0x66   : > { %638 = vmatpush.msrb.mxu2 %v1797_v7  ;;  %658 = vmatpush.msrb.mxu3 %v1799_v8  ;;  %v1907_v45 = vld [vmem:[#allocation10 + $0xb0] sm:$0xff]  ;;  %v1909_v46 = vld [vmem:[#allocation10 + $0xb8] sm:$0xff]  ;;  %v1913_v47 = vld [vmem:[#allocation10 + $0x80] sm:$0xff] }
  0x67   : > { %599 = vmatpush.msrb.mxu0 %v1803_v9  ;;  %619 = vmatpush.msrb.mxu1 %v1805_v10  ;;  %v1915_v48 = vld [vmem:[#allocation10 + $0x88] sm:$0xff]  ;;  %v1919_v49 = vld [vmem:[#allocation10 + $0x90] sm:$0xff]  ;;  %v1921_v50 = vld [vmem:[#allocation10 + $0x98] sm:$0xff] }
  0x68   : > { %639 = vmatpush.msrb.mxu2 %v1809_v11  ;;  %659 = vmatpush.msrb.mxu3 %v1811_v12  ;;  %v332_v51 = vld [vmem:[%s1767_s28 + $0x10] sm:$0xff]  ;;  %v1932_v53 = vld [vmem:[#allocation10 + $0x68] sm:$0xff]  ;;  %v1934_v54 = vld [vmem:[#allocation10 + $0x70] sm:$0xff] }
  0x69   : > { %600 = vmatpush.msrb.mxu0 %v1815_v13  ;;  %620 = vmatpush.msrb.mxu1 %v1817_v14  ;;  %v1930_v52 = vld [vmem:[#allocation10 + $0x60] sm:$0xff]  ;;  %v1936_v55 = vld [vmem:[#allocation10 + $0x78] sm:$0xff]  ;;  %v1940_v57 = vld [vmem:[#allocation10 + $0x48] sm:$0xff] }
  0x6a   : > { %640 = vmatpush.msrb.mxu2 %v1821_v15  ;;  %660 = vmatpush.msrb.mxu3 %v1823_v16  ;;  %v1938_v56 = vld [vmem:[#allocation10 + $0x40] sm:$0xff]  ;;  %2224 = vst [vmem:[#allocation19_spill] sm:$0xff] %v1940_v57  ;;  %v1944_v58 = vld [vmem:[#allocation10 + $0x50] sm:$0xff]  ;;  %v1946_v59 = vld [vmem:[#allocation10 + $0x58] sm:$0xff] }
  0x6b   : > { %423 = vmatmul.f32.vlgmr.msra.gmra.mxu0 %v330_v17  ;;  %449 = vmatmul.f32.vlgmr.msra.gmra.mxu1 %v330_v17  ;;  %v1950_v60 = vld [vmem:[#allocation10 + $0x20] sm:$0xff]  ;;  %v1952_v61 = vld [vmem:[#allocation10 + $0x28] sm:$0xff]  ;;  %v1956_v62 = vld [vmem:[#allocation10 + $0x30] sm:$0xff] }
  0x6c   : > { %475 = vmatmul.f32.vlgmr.msra.gmra.mxu2 %v330_v17  ;;  %501 = vmatmul.f32.vlgmr.msra.gmra.mxu3 %v330_v17  ;;  %v1958_v63 = vld [vmem:[#allocation10 + $0x38] sm:$0xff]  ;;  %v1962_v0 = vld [vmem:[#allocation10] sm:$0xff]  ;;  %v1964_v17 = vld [vmem:[#allocation10 + $0x8] sm:$0xff] }
  0x6d   : > { %601 = vmatpush.msrb.mxu0 %v1832_v18  ;;  %621 = vmatpush.msrb.mxu1 %v1834_v19 }
  0x6e   : > { %641 = vmatpush.msrb.mxu2 %v1836_v20  ;;  %661 = vmatpush.msrb.mxu3 %v1838_v21 }
  0x6f   : > { %602 = vmatpush.msrb.mxu0 %v1840_v22  ;;  %622 = vmatpush.msrb.mxu1 %v1842_v23 }
  0x70   : > { %642 = vmatpush.msrb.mxu2 %v1846_v24  ;;  %662 = vmatpush.msrb.mxu3 %v1848_v25 }
  0x71   : > { %603 = vmatpush.msrb.mxu0 %v1852_v26  ;;  %623 = vmatpush.msrb.mxu1 %v1854_v27 }
  0x72   : > { %643 = vmatpush.msrb.mxu2 %v1858_v28  ;;  %663 = vmatpush.msrb.mxu3 %v1860_v29 }
  0x73   : > { %604 = vmatpush.msrb.mxu0 %v1864_v30  ;;  %624 = vmatpush.msrb.mxu1 %v1866_v31 }
  0x74   : > { %644 = vmatpush.msrb.mxu2 %v1870_v32  ;;  %664 = vmatpush.msrb.mxu3 %v1872_v33 }
  0x75   : > { %426 = vmatmul.f32.gmra.mxu0 %v331_v34  ;;  %452 = vmatmul.f32.gmra.mxu1 %v331_v34 }
  0x76   : > { %478 = vmatmul.f32.gmra.mxu2 %v331_v34  ;;  %504 = vmatmul.f32.gmra.mxu3 %v331_v34  ;;  %v1968_v34 = vld [vmem:[#allocation10 + $0x10] sm:$0xff] }
  0x77   : > { %605 = vmatpush.msrb.mxu0 %v1881_v35  ;;  %625 = vmatpush.msrb.mxu1 %v1883_v36 }
  0x78   : > { %645 = vmatpush.msrb.mxu2 %v1885_v37  ;;  %665 = vmatpush.msrb.mxu3 %v1887_v38 }
  0x79   : > { %606 = vmatpush.msrb.mxu0 %v1889_v39  ;;  %626 = vmatpush.msrb.mxu1 %v1891_v40 }
  0x7a   : > { %646 = vmatpush.msrb.mxu2 %v1895_v41  ;;  %666 = vmatpush.msrb.mxu3 %v1897_v42 }
  0x7b   : > { %607 = vmatpush.msrb.mxu0 %v1901_v43  ;;  %627 = vmatpush.msrb.mxu1 %v1903_v44 }
  0x7c   : > { %647 = vmatpush.msrb.mxu2 %v1907_v45  ;;  %667 = vmatpush.msrb.mxu3 %v1909_v46 }
  0x7d   : > { %608 = vmatpush.msrb.mxu0 %v1913_v47  ;;  %628 = vmatpush.msrb.mxu1 %v1915_v48 }
  0x7e   : > { %648 = vmatpush.msrb.mxu2 %v1919_v49  ;;  %668 = vmatpush.msrb.mxu3 %v1921_v50 }
  0x7f   : > { %429 = vmatmul.f32.gmra.mxu0 %v332_v51  ;;  %455 = vmatmul.f32.gmra.mxu1 %v332_v51 }
  0x80   : > { %481 = vmatmul.f32.gmra.mxu2 %v332_v51  ;;  %507 = vmatmul.f32.gmra.mxu3 %v332_v51  ;;  %v1970_v51 = vld [vmem:[#allocation10 + $0x18] sm:$0xff] }
  0x81   : > { %609 = vmatpush.msrb.mxu0 %v1930_v52  ;;  %629 = vmatpush.msrb.mxu1 %v1932_v53 }
  0x82   : > { %649 = vmatpush.msrb.mxu2 %v1934_v54  ;;  %669 = vmatpush.msrb.mxu3 %v1936_v55 }
  0x83   : > { %610 = vmatpush.msrb.mxu0 %v1938_v56  ;;  %630 = vmatpush.msrb.mxu1 %v1940_v57  ;;  %v1974_v57 = vld [vmem:[#allocation2] sm:$0xff] }
  0x84   : > { %650 = vmatpush.msrb.mxu2 %v1944_v58  ;;  %670 = vmatpush.msrb.mxu3 %v1946_v59  ;;  %2225 = vst [vmem:[#allocation20_spill] sm:$0xff] %v1974_v57 }
  0x85   : > { %611 = vmatpush.msrb.mxu0 %v1950_v60  ;;  %631 = vmatpush.msrb.mxu1 %v1952_v61 }
  0x86   : > { %651 = vmatpush.msrb.mxu2 %v1956_v62  ;;  %671 = vmatpush.msrb.mxu3 %v1958_v63 }
  0x87   : > { %612 = vmatpush.msrb.mxu0 %v1962_v0  ;;  %632 = vmatpush.msrb.mxu1 %v1964_v17 }
  0x88   : > { %652 = vmatpush.msrb.mxu2 %v1968_v34  ;;  %672 = vmatpush.msrb.mxu3 %v1970_v51 }
  0x89   : > { %613 = vmatmul.f32.vlgmr.msrb.gmra.mxu0 %v1974_v57  ;;  %633 = vmatmul.f32.vlgmr.msrb.gmra.mxu1 %v1974_v57 }
  0x8a   : > { %653 = vmatmul.f32.vlgmr.msrb.gmra.mxu2 %v1974_v57  ;;  %673 = vmatmul.f32.vlgmr.msrb.gmra.mxu3 %v1974_v57  ;;  %v2226_v57 = vld [vmem:[#allocation19_spill] sm:$0xff] }
  0x8b   : > { %757 = vmatpush.msra.mxu0 %v1783_v1  ;;  %777 = vmatpush.msra.mxu1 %v1785_v2 }
  0x8c   : > { %797 = vmatpush.msra.mxu2 %v1787_v3  ;;  %817 = vmatpush.msra.mxu3 %v1789_v4 }
  0x8d   : > { %758 = vmatpush.msra.mxu0 %v1791_v5  ;;  %778 = vmatpush.msra.mxu1 %v1793_v6 }
  0x8e   : > { %798 = vmatpush.msra.mxu2 %v1797_v7  ;;  %818 = vmatpush.msra.mxu3 %v1799_v8 }
  0x8f   : > { %759 = vmatpush.msra.mxu0 %v1803_v9  ;;  %779 = vmatpush.msra.mxu1 %v1805_v10 }
  0x90   : > { %799 = vmatpush.msra.mxu2 %v1809_v11  ;;  %819 = vmatpush.msra.mxu3 %v1811_v12 }
  0x91   : > { %760 = vmatpush.msra.mxu0 %v1815_v13  ;;  %780 = vmatpush.msra.mxu1 %v1817_v14 }
  0x92   : > { %800 = vmatpush.msra.mxu2 %v1821_v15  ;;  %820 = vmatpush.msra.mxu3 %v1823_v16 }
  0x93   : > { %761 = vmatpush.msra.mxu0 %v1832_v18  ;;  %781 = vmatpush.msra.mxu1 %v1834_v19 }
  0x94   : > { %801 = vmatpush.msra.mxu2 %v1836_v20  ;;  %821 = vmatpush.msra.mxu3 %v1838_v21 }
  0x95   : > { %762 = vmatpush.msra.mxu0 %v1840_v22  ;;  %782 = vmatpush.msra.mxu1 %v1842_v23 }
  0x96   : > { %802 = vmatpush.msra.mxu2 %v1846_v24  ;;  %822 = vmatpush.msra.mxu3 %v1848_v25 }
  0x97   : > { %763 = vmatpush.msra.mxu0 %v1852_v26  ;;  %783 = vmatpush.msra.mxu1 %v1854_v27 }
  0x98   : > { %803 = vmatpush.msra.mxu2 %v1858_v28  ;;  %823 = vmatpush.msra.mxu3 %v1860_v29 }
  0x99   : > { %764 = vmatpush.msra.mxu0 %v1864_v30  ;;  %784 = vmatpush.msra.mxu1 %v1866_v31 }
  0x9a   : > { %804 = vmatpush.msra.mxu2 %v1870_v32  ;;  %824 = vmatpush.msra.mxu3 %v1872_v33 }
  0x9b   : > { %765 = vmatpush.msra.mxu0 %v1881_v35  ;;  %785 = vmatpush.msra.mxu1 %v1883_v36 }
  0x9c   : > { %805 = vmatpush.msra.mxu2 %v1885_v37  ;;  %825 = vmatpush.msra.mxu3 %v1887_v38 }
  0x9d   : > { %766 = vmatpush.msra.mxu0 %v1889_v39  ;;  %786 = vmatpush.msra.mxu1 %v1891_v40 }
  0x9e   : > { %806 = vmatpush.msra.mxu2 %v1895_v41  ;;  %826 = vmatpush.msra.mxu3 %v1897_v42 }
  0x9f   : > { %767 = vmatpush.msra.mxu0 %v1901_v43  ;;  %787 = vmatpush.msra.mxu1 %v1903_v44 }
  0xa0   : > { %807 = vmatpush.msra.mxu2 %v1907_v45  ;;  %827 = vmatpush.msra.mxu3 %v1909_v46 }
  0xa1   : > { %768 = vmatpush.msra.mxu0 %v1913_v47  ;;  %788 = vmatpush.msra.mxu1 %v1915_v48 }
  0xa2   : > { %808 = vmatpush.msra.mxu2 %v1919_v49  ;;  %828 = vmatpush.msra.mxu3 %v1921_v50 }
  0xa3   : > { %769 = vmatpush.msra.mxu0 %v1930_v52  ;;  %789 = vmatpush.msra.mxu1 %v1932_v53 }
  0xa4   : > { %809 = vmatpush.msra.mxu2 %v1934_v54  ;;  %829 = vmatpush.msra.mxu3 %v1936_v55 }
  0xa5   : > { %770 = vmatpush.msra.mxu0 %v1938_v56  ;;  %790 = vmatpush.msra.mxu1 %v2226_v57 }
  0xa6   : > { %810 = vmatpush.msra.mxu2 %v1944_v58  ;;  %830 = vmatpush.msra.mxu3 %v1946_v59 }
  0xa7   : > { %771 = vmatpush.msra.mxu0 %v1950_v60  ;;  %791 = vmatpush.msra.mxu1 %v1952_v61 }
  0xa8   : > { %811 = vmatpush.msra.mxu2 %v1956_v62  ;;  %831 = vmatpush.msra.mxu3 %v1958_v63 }
  0xa9   : > { %772 = vmatpush.msra.mxu0 %v1962_v0  ;;  %792 = vmatpush.msra.mxu1 %v1964_v17 }
  0xaa   : > { %812 = vmatpush.msra.mxu2 %v1968_v34  ;;  %832 = vmatpush.msra.mxu3 %v1970_v51 }
  0xab   : > { %918 = vmatpush.msrb.mxu0 %v1783_v1  ;;  %938 = vmatpush.msrb.mxu1 %v1785_v2 }
  0xac   : > { %958 = vmatpush.msrb.mxu2 %v1787_v3  ;;  %978 = vmatpush.msrb.mxu3 %v1789_v4  ;;  %v397_v3 = vld [vmem:[#allocation11] sm:$0xf] }
  0xad   : > { %919 = vmatpush.msrb.mxu0 %v1791_v5  ;;  %939 = vmatpush.msrb.mxu1 %v1793_v6  ;;  %v399_v6 = vperm.slane %v397_v3, 0 }
  0xae   : > { %959 = vmatpush.msrb.mxu2 %v1797_v7  ;;  %979 = vmatpush.msrb.mxu3 %v1799_v8  ;;  %v400_v7 = vperm.slane %v397_v3, 1 }
  0xaf   : > { %920 = vmatpush.msrb.mxu0 %v1803_v9  ;;  %940 = vmatpush.msrb.mxu1 %v1805_v10 }
  0xb0   : > { %960 = vmatpush.msrb.mxu2 %v1809_v11  ;;  %980 = vmatpush.msrb.mxu3 %v1811_v12  ;;  %v401_v12 = vperm.slane %v397_v3, 2 }
  0xb1   : > { %921 = vmatpush.msrb.mxu0 %v1815_v13  ;;  %941 = vmatpush.msrb.mxu1 %v1817_v14  ;;  %v402_v13 = vperm.slane %v397_v3, 3  ;;  %v746_v3 = vstv %s745_s30 }
  0xb2   : > { %961 = vmatpush.msrb.mxu2 %v1821_v15  ;;  %981 = vmatpush.msrb.mxu3 %v1823_v16  ;;  %vm2132_vm8 = vcmp.eq.s32.totalorder %v746_v3, 1 }
  0xb3   : > { %922 = vmatpush.msrb.mxu0 %v1832_v18  ;;  %942 = vmatpush.msrb.mxu1 %v1834_v19 }
  0xb4   : > { %962 = vmatpush.msrb.mxu2 %v1836_v20  ;;  %982 = vmatpush.msrb.mxu3 %v1838_v21 }
  0xb5   : > { %923 = vmatpush.msrb.mxu0 %v1840_v22  ;;  %943 = vmatpush.msrb.mxu1 %v1842_v23 }
  0xb6   : > { %963 = vmatpush.msrb.mxu2 %v1846_v24  ;;  %983 = vmatpush.msrb.mxu3 %v1848_v25 }
  0xb7   : > { %924 = vmatpush.msrb.mxu0 %v1852_v26  ;;  %944 = vmatpush.msrb.mxu1 %v1854_v27 }
  0xb8   : > { %964 = vmatpush.msrb.mxu2 %v1858_v28  ;;  %984 = vmatpush.msrb.mxu3 %v1860_v29 }
  0xb9   : > { %925 = vmatpush.msrb.mxu0 %v1864_v30  ;;  %945 = vmatpush.msrb.mxu1 %v1866_v31 }
  0xba   : > { %965 = vmatpush.msrb.mxu2 %v1870_v32  ;;  %985 = vmatpush.msrb.mxu3 %v1872_v33 }
  0xbb   : > { %926 = vmatpush.msrb.mxu0 %v1881_v35  ;;  %946 = vmatpush.msrb.mxu1 %v1883_v36 }
  0xbc   : > { %966 = vmatpush.msrb.mxu2 %v1885_v37  ;;  %986 = vmatpush.msrb.mxu3 %v1887_v38 }
  0xbd   : > { %927 = vmatpush.msrb.mxu0 %v1889_v39  ;;  %947 = vmatpush.msrb.mxu1 %v1891_v40 }
  0xbe   : > { %967 = vmatpush.msrb.mxu2 %v1895_v41  ;;  %987 = vmatpush.msrb.mxu3 %v1897_v42 }
  0xbf   : > { %928 = vmatpush.msrb.mxu0 %v1901_v43  ;;  %948 = vmatpush.msrb.mxu1 %v1903_v44 }
  0xc0   : > { %968 = vmatpush.msrb.mxu2 %v1907_v45  ;;  %988 = vmatpush.msrb.mxu3 %v1909_v46 }
  0xc1   : > { %929 = vmatpush.msrb.mxu0 %v1913_v47  ;;  %949 = vmatpush.msrb.mxu1 %v1915_v48 }
  0xc2   : > { %969 = vmatpush.msrb.mxu2 %v1919_v49  ;;  %989 = vmatpush.msrb.mxu3 %v1921_v50 }
  0xc3   : > { %930 = vmatpush.msrb.mxu0 %v1930_v52  ;;  %950 = vmatpush.msrb.mxu1 %v1932_v53 }
  0xc4   : > { %970 = vmatpush.msrb.mxu2 %v1934_v54  ;;  %990 = vmatpush.msrb.mxu3 %v1936_v55 }
  0xc5   : > { %931 = vmatpush.msrb.mxu0 %v1938_v56  ;;  %951 = vmatpush.msrb.mxu1 %v2226_v57 }
  0xc6   : > { %971 = vmatpush.msrb.mxu2 %v1944_v58  ;;  %991 = vmatpush.msrb.mxu3 %v1946_v59 }
  0xc7   : > { %932 = vmatpush.msrb.mxu0 %v1950_v60  ;;  %952 = vmatpush.msrb.mxu1 %v1952_v61 }
  0xc8   : > { %972 = vmatpush.msrb.mxu2 %v1956_v62  ;;  %992 = vmatpush.msrb.mxu3 %v1958_v63 }
  0xc9   : > { %933 = vmatpush.msrb.mxu0 %v1962_v0  ;;  %953 = vmatpush.msrb.mxu1 %v1964_v17 }
  0xca   : > { %973 = vmatpush.msrb.mxu2 %v1968_v34  ;;  %993 = vmatpush.msrb.mxu3 %v1970_v51 }
  0xe8   : > { %v424_v1 = vpop.f32.mrf.mxu0  ;;  %v450_v2 = vpop.f32.mrf.mxu1 }
  0xe9   : > { %v425_v27 = vadd.f32 %v424_v1, %v399_v6  ;;  %v451_v28 = vadd.f32 %v450_v2, %v400_v7  ;;  %v589_v1 = vld [vmem:[#allocation3] sm:$0xff] }
  0xef   : > { %v476_v4 = vpop.f32.mrf.mxu2  ;;  %v502_v5 = vpop.f32.mrf.mxu3 }
  0xf0   : > { %v477_v36 = vadd.f32 %v476_v4, %v401_v12  ;;  %v503_v46 = vadd.f32 %v502_v5, %v402_v13 }
  0xf2   : > { %v427_v8 = vpop.f32.mrf.mxu0  ;;  %v453_v9 = vpop.f32.mrf.mxu1 }
  0xf3   : > { %v2112_v10 = vadd.f32 %v427_v8, %v399_v6  ;;  %v2114_v11 = vadd.f32 %v453_v9, %v400_v7 }
  0xf9   : > { %v479_v14 = vpop.f32.mrf.mxu2  ;;  %v505_v15 = vpop.f32.mrf.mxu3 }
  0xfa   : > { %v2116_v16 = vadd.f32 %v479_v14, %v401_v12  ;;  %v2118_v18 = vadd.f32 %v505_v15, %v402_v13 }
  0xfc   : > { %v430_v19 = vpop.f32.mrf.mxu0  ;;  %v456_v20 = vpop.f32.mrf.mxu1 }
  0xfd   : > { %v2120_v21 = vadd.f32 %v430_v19, %v399_v6  ;;  %v2122_v22 = vadd.f32 %v456_v20, %v400_v7 }
 0x103   : > { %v482_v23 = vpop.f32.mrf.mxu2  ;;  %v508_v24 = vpop.f32.mrf.mxu3 }
 0x104   : > { %v2124_v25 = vadd.f32 %v482_v23, %v401_v12  ;;  %v2126_v26 = vadd.f32 %v508_v24, %v402_v13 }
 0x106   : > { %v614_v29 = vpop.f32.mrf.mxu0  ;;  %v634_v30 = vpop.f32.mrf.mxu1 }
 0x107   : > { %v677_v31 = vadd.f32 %v614_v29, %v425_v27  ;;  %v678_v32 = vadd.f32 %v634_v30, %v451_v28 }
 0x109   : > { %v1233_v33 = vmul.f32 -1.442695, %v677_v31  ;;  %v1234_v35 = vmul.f32 -1.442695, %v678_v32  ;;  %v2229_v32 = vld [vmem:[#allocation20_spill] sm:$0xff] }
 0x10b   : > { %1342 = vpow2.f32 %v1233_v33 }
 0x10c   : > { %1344 = vpow2.f32 %v1234_v35 }
 0x10d   : > { %v654_v37 = vpop.f32.mrf.mxu2  ;;  %v674_v44 = vpop.f32.mrf.mxu3 }
 0x10e   : > { %v679_v38 = vadd.f32 %v654_v37, %v477_v36  ;;  %v680_v49 = vadd.f32 %v674_v44, %v503_v46 }
 0x110   : > { %v1235_v39 = vmul.f32 -1.442695, %v679_v38 }
 0x111   : > { %v1343_v40 = vpop.eup %1342 }
 0x112   : > { %v1345_v41 = vpop.eup %1344  ;;  %v690_v42 = vadd.f32 1.0, %v1343_v40  ;;  %1346 = vpow2.f32 %v1235_v39 }
 0x113   : > { %v691_v43 = vadd.f32 1.0, %v1345_v41 }
 0x114   : > { %1348 = vrcp.f32 %v690_v42  ;;  %v704_v56 = vand.u32 2147483648, %v690_v42  ;;  %v702_v59 = vand.u32 2147483647, %v690_v42  ;;  %vm698_vm2 = vweird.f32 %v690_v42 }
 0x115   : > { %1350 = vrcp.f32 %v691_v43  ;;  %v719_v57 = vand.u32 2147483648, %v691_v43  ;;  %v717_v61 = vand.u32 2147483647, %v691_v43  ;;  %vm713_vm3 = vweird.f32 %v691_v43 }
 0x116   : > { %v705_v17 = vor.u32 1.1754944e-38, %v704_v56  ;;  %vm703_vm6 = vcmp.eq.f32.partialorder %v702_v59, 8.507059e+37 }
 0x117   : > { %v720_v51 = vor.u32 1.1754944e-38, %v719_v57  ;;  %vm718_vm7 = vcmp.eq.f32.partialorder %v717_v61, 8.507059e+37 }
 0x118   : > { %v1347_v45 = vpop.eup %1346 }
 0x119   : > { %v692_v47 = vadd.f32 1.0, %v1347_v45 }
 0x11a   : > { %v1349_v48 = vpop.eup %1348 }
 0x11b   : > { %v1351_v50 = vpop.eup %1350  ;;  %v694_v52 = vmul.f32 %v1349_v48, %v690_v42  ;;  %1352 = vrcp.f32 %v692_v47  ;;  %vm699_vm0 = vweird.f32 %v1349_v48  ;;  %v734_v20 = vand.u32 2147483648, %v692_v47 }
 0x11c   : > { %v709_v53 = vmul.f32 %v1351_v50, %v691_v43  ;;  %1354 = vtanh.f32 %v680_v49  ;;  %vm714_vm1 = vweird.f32 %v1351_v50  ;;  %vm700_vm4 = vmor %vm698_vm2, %vm699_vm0  ;;  %vm728_vm10 = vweird.f32 %v692_v47 }
 0x11d   : > { %v695_v54 = vsub.f32 1.0, %v694_v52  ;;  %vm715_vm5 = vmor %vm713_vm3, %vm714_vm1  ;;  %v732_v24 = vand.u32 2147483647, %v692_v47  ;;  %v735_v28 = vor.u32 1.1754944e-38, %v734_v20 }
 0x11e   : > { %v710_v55 = vsub.f32 1.0, %v709_v53 }
 0x11f   : > { %v696_v58 = vmul.f32 %v1349_v48, %v695_v54  ;;  %vm733_vm12 = vcmp.eq.f32.partialorder %v732_v24, 8.507059e+37 }
 0x120   : > { %v711_v60 = vmul.f32 %v1351_v50, %v710_v55 }
 0x121   : > { %v1353_v62 = vpop.eup %1352  ;;  %v697_v63 = vadd.f32 %v1349_v48, %v696_v58 }
 0x122   : > { %v724_v0 = vmul.f32 %v1353_v62, %v692_v47  ;;  %v712_v34 = vadd.f32 %v1351_v50, %v711_v60  ;;  %v1355_v4 = vpop.eup %1354  ;;  %vm729_vm9 = vweird.f32 %v1353_v62 }
 0x123   : > { %v701_v2 = vsel %vm700_vm4, %v1349_v48, %v697_v63  ;;  %vm730_vm11 = vmor %vm728_vm10, %vm729_vm9 }
 0x124   : > { %v725_v5 = vsub.f32 1.0, %v724_v0  ;;  %v706_v6 = vsel %vm703_vm6, %v705_v17, %v701_v2  ;;  %v716_v7 = vsel %vm715_vm5, %v1351_v50, %v712_v34 }
 0x125   : > { %v721_v8 = vsel %vm718_vm7, %v720_v51, %v716_v7  ;;  %v740_v9 = vmul.f32 %v1355_v4, %v706_v6 }
 0x126   : > { %v726_v12 = vmul.f32 %v1353_v62, %v725_v5  ;;  %v739_v13 = vmul.f32 %v721_v8, %v589_v1 }
 0x128   : > { %v741_v15 = vadd.f32 %v740_v9, %v739_v13  ;;  %v727_v19 = vadd.f32 %v1353_v62, %v726_v12 }
 0x12a   : > { %1356 = vtanh.f32 %v741_v15  ;;  %v2138_v23 = vsel %vm2132_vm8, %v741_v15, %v589_v1  ;;  %v731_v27 = vsel %vm730_vm11, %v1353_v62, %v727_v19  ;;  %v907_v1 = vstv %s906_s21 }
 0x12b   : > { %v736_v30 = vsel %vm733_vm12, %v735_v28, %v731_v27  ;;  %vm908_vm5 = vcmp.eq.s32.totalorder %v907_v1, 1 }
 0x130   : > { %v1357_v29 = vpop.eup %1356 }
 0x131   : > { %v743_v31 = vmul.f32 %v1357_v29, %v736_v30 }
 0x133   : > { %v2143_v33 = vsel %vm2132_vm8, %v743_v31, %v2229_v32 }
 0x134   : > { %773 = vmatmul.f32.vlgmr.msra.gmra.mxu0 %v2143_v33  ;;  %793 = vmatmul.f32.vlgmr.msra.gmra.mxu1 %v2143_v33 }
 0x135   : > { %813 = vmatmul.f32.vlgmr.msra.gmra.mxu2 %v2143_v33  ;;  %833 = vmatmul.f32.vlgmr.msra.gmra.mxu3 %v2143_v33 }
 0x1b1   : > { %v774_v35 = vpop.f32.mrf.mxu0  ;;  %v794_v36 = vpop.f32.mrf.mxu1 }
 0x1b2   : > { %v837_v37 = vadd.f32 %v774_v35, %v2112_v10  ;;  %v838_v38 = vadd.f32 %v794_v36, %v2114_v11 }
 0x1b4   : > { %v1236_v39 = vmul.f32 -1.442695, %v837_v37  ;;  %v1237_v40 = vmul.f32 -1.442695, %v838_v38 }
 0x1b6   : > { %1358 = vpow2.f32 %v1236_v39 }
 0x1b7   : > { %1360 = vpow2.f32 %v1237_v40 }
 0x1b8   : > { %v814_v41 = vpop.f32.mrf.mxu2  ;;  %v834_v48 = vpop.f32.mrf.mxu3 }
 0x1b9   : > { %v839_v42 = vadd.f32 %v814_v41, %v2116_v16  ;;  %v840_v50 = vadd.f32 %v834_v48, %v2118_v18 }
 0x1bb   : > { %v1238_v43 = vmul.f32 -1.442695, %v839_v42 }
 0x1bc   : > { %v1359_v44 = vpop.eup %1358 }
 0x1bd   : > { %v1361_v45 = vpop.eup %1360  ;;  %v850_v46 = vadd.f32 1.0, %v1359_v44  ;;  %1362 = vpow2.f32 %v1238_v43 }
 0x1be   : > { %v851_v47 = vadd.f32 1.0, %v1361_v45 }
 0x1bf   : > { %1364 = vrcp.f32 %v850_v46  ;;  %v864_v56 = vand.u32 2147483648, %v850_v46  ;;  %v862_v59 = vand.u32 2147483647, %v850_v46  ;;  %vm858_vm15 = vweird.f32 %v850_v46 }
 0x1c0   : > { %1366 = vrcp.f32 %v851_v47  ;;  %v879_v57 = vand.u32 2147483648, %v851_v47  ;;  %v877_v60 = vand.u32 2147483647, %v851_v47  ;;  %vm873_vm0 = vweird.f32 %v851_v47 }
 0x1c1   : > { %v865_v0 = vor.u32 1.1754944e-38, %v864_v56  ;;  %vm863_vm3 = vcmp.eq.f32.partialorder %v862_v59, 8.507059e+37 }
 0x1c2   : > { %v880_v34 = vor.u32 1.1754944e-38, %v879_v57  ;;  %vm878_vm4 = vcmp.eq.f32.partialorder %v877_v60, 8.507059e+37  ;;  %v1068_v60 = vstv %s1067_s7 }
 0x1c3   : > { %v1363_v10 = vpop.eup %1362 }
 0x1c4   : > { %v852_v11 = vadd.f32 1.0, %v1363_v10 }
 0x1c5   : > { %v1365_v49 = vpop.eup %1364 }
 0x1c6   : > { %v1367_v52 = vpop.eup %1366  ;;  %v854_v53 = vmul.f32 %v1365_v49, %v850_v46  ;;  %1368 = vrcp.f32 %v852_v11  ;;  %vm859_vm13 = vweird.f32 %v1365_v49  ;;  %v894_v14 = vand.u32 2147483648, %v852_v11 }
 0x1c7   : > { %v869_v16 = vmul.f32 %v1367_v52, %v851_v47  ;;  %1370 = vtanh.f32 %v840_v50  ;;  %vm874_vm14 = vweird.f32 %v1367_v52  ;;  %vm860_vm1 = vmor %vm858_vm15, %vm859_vm13  ;;  %vm888_vm7 = vweird.f32 %v852_v11 }
 0x1c8   : > { %v855_v54 = vsub.f32 1.0, %v854_v53  ;;  %vm875_vm2 = vmor %vm873_vm0, %vm874_vm14  ;;  %v892_v19 = vand.u32 2147483647, %v852_v11  ;;  %v895_v24 = vor.u32 1.1754944e-38, %v894_v14 }
 0x1c9   : > { %v870_v55 = vsub.f32 1.0, %v869_v16 }
 0x1ca   : > { %v856_v58 = vmul.f32 %v1365_v49, %v855_v54  ;;  %vm893_vm9 = vcmp.eq.f32.partialorder %v892_v19, 8.507059e+37 }
 0x1cb   : > { %v871_v18 = vmul.f32 %v1367_v52, %v870_v55 }
 0x1cc   : > { %v1369_v61 = vpop.eup %1368  ;;  %v857_v62 = vadd.f32 %v1365_v49, %v856_v58 }
 0x1cd   : > { %v884_v63 = vmul.f32 %v1369_v61, %v852_v11  ;;  %v872_v17 = vadd.f32 %v1367_v52, %v871_v18  ;;  %v1371_v2 = vpop.eup %1370  ;;  %vm889_vm6 = vweird.f32 %v1369_v61 }
 0x1ce   : > { %v861_v51 = vsel %vm860_vm1, %v1365_v49, %v857_v62  ;;  %vm890_vm8 = vmor %vm888_vm7, %vm889_vm6 }
 0x1cf   : > { %v885_v3 = vsub.f32 1.0, %v884_v63  ;;  %v866_v4 = vsel %vm863_vm3, %v865_v0, %v861_v51  ;;  %v876_v5 = vsel %vm875_vm2, %v1367_v52, %v872_v17  ;;  %vm1069_vm2 = vcmp.eq.s32.totalorder %v1068_v60, 1 }
 0x1d0   : > { %v881_v6 = vsel %vm878_vm4, %v880_v34, %v876_v5  ;;  %v900_v7 = vmul.f32 %v1371_v2, %v866_v4 }
 0x1d1   : > { %v886_v8 = vmul.f32 %v1369_v61, %v885_v3  ;;  %v899_v9 = vmul.f32 %v881_v6, %v2138_v23 }
 0x1d3   : > { %v901_v12 = vadd.f32 %v900_v7, %v899_v9  ;;  %v887_v13 = vadd.f32 %v1369_v61, %v886_v8 }
 0x1d5   : > { %1372 = vtanh.f32 %v901_v12  ;;  %v2163_v15 = vsel %vm908_vm5, %v901_v12, %v2138_v23  ;;  %v891_v20 = vsel %vm890_vm8, %v1369_v61, %v887_v13 }
 0x1d6   : > { %v896_v28 = vsel %vm893_vm9, %v895_v24, %v891_v20 }
 0x1db   : > { %v1373_v27 = vpop.eup %1372 }
 0x1dc   : > { %v903_v29 = vmul.f32 %v1373_v27, %v896_v28 }
 0x1de   : > { %v2167_v30 = vsel %vm908_vm5, %v903_v29, %v2143_v33 }
 0x1df   : > { %934 = vmatmul.f32.vlgmr.msrb.gmra.mxu0 %v2167_v30  ;;  %954 = vmatmul.f32.vlgmr.msrb.gmra.mxu1 %v2167_v30 }
 0x1e0   : > { %974 = vmatmul.f32.vlgmr.msrb.gmra.mxu2 %v2167_v30  ;;  %994 = vmatmul.f32.vlgmr.msrb.gmra.mxu3 %v2167_v30 }
 0x25c   : > { %v935_v23 = vpop.f32.mrf.mxu0  ;;  %v955_v31 = vpop.f32.mrf.mxu1 }
 0x25d   : > { %v998_v32 = vadd.f32 %v935_v23, %v2120_v21  ;;  %v999_v35 = vadd.f32 %v955_v31, %v2122_v22 }
 0x25f   : > { %v1239_v36 = vmul.f32 -1.442695, %v998_v32  ;;  %v1240_v37 = vmul.f32 -1.442695, %v999_v35 }
 0x261   : > { %1374 = vpow2.f32 %v1239_v36 }
 0x262   : > { %1376 = vpow2.f32 %v1240_v37 }
 0x263   : > { %v975_v33 = vpop.f32.mrf.mxu2  ;;  %v995_v44 = vpop.f32.mrf.mxu3 }
 0x264   : > { %v1000_v38 = vadd.f32 %v975_v33, %v2124_v25  ;;  %v1001_v46 = vadd.f32 %v995_v44, %v2126_v26 }
 0x266   : > { %v1241_v39 = vmul.f32 -1.442695, %v1000_v38 }
 0x267   : > { %v1375_v40 = vpop.eup %1374 }
 0x268   : > { %v1377_v41 = vpop.eup %1376  ;;  %v1011_v42 = vadd.f32 1.0, %v1375_v40  ;;  %1378 = vpow2.f32 %v1241_v39 }
 0x269   : > { %v1012_v43 = vadd.f32 1.0, %v1377_v41 }
 0x26a   : > { %1380 = vrcp.f32 %v1011_v42  ;;  %v1025_v49 = vand.u32 2147483648, %v1011_v42  ;;  %v1023_v53 = vand.u32 2147483647, %v1011_v42  ;;  %vm1019_vm12 = vweird.f32 %v1011_v42 }
 0x26b   : > { %1382 = vrcp.f32 %v1012_v43  ;;  %v1040_v50 = vand.u32 2147483648, %v1012_v43  ;;  %v1038_v16 = vand.u32 2147483647, %v1012_v43  ;;  %vm1034_vm13 = vweird.f32 %v1012_v43 }
 0x26c   : > { %v1026_v57 = vor.u32 1.1754944e-38, %v1025_v49  ;;  %vm1024_vm0 = vcmp.eq.f32.partialorder %v1023_v53, 8.507059e+37 }
 0x26d   : > { %v1041_v59 = vor.u32 1.1754944e-38, %v1040_v50  ;;  %vm1039_vm1 = vcmp.eq.f32.partialorder %v1038_v16, 8.507059e+37 }
 0x26e   : > { %v1379_v21 = vpop.eup %1378 }
 0x26f   : > { %v1013_v22 = vadd.f32 1.0, %v1379_v21 }
 0x270   : > { %v1381_v45 = vpop.eup %1380 }
 0x271   : > { %v1383_v47 = vpop.eup %1382  ;;  %v1015_v48 = vmul.f32 %v1381_v45, %v1011_v42  ;;  %1384 = vrcp.f32 %v1013_v22  ;;  %vm1020_vm10 = vweird.f32 %v1381_v45  ;;  %v1055_v4 = vand.u32 2147483648, %v1013_v22 }
 0x272   : > { %v1030_v25 = vmul.f32 %v1383_v47, %v1012_v43  ;;  %1386 = vtanh.f32 %v1001_v46  ;;  %vm1035_vm11 = vweird.f32 %v1383_v47  ;;  %vm1021_vm14 = vmor %vm1019_vm12, %vm1020_vm10  ;;  %vm1049_vm4 = vweird.f32 %v1013_v22 }
 0x273   : > { %v1016_v10 = vsub.f32 1.0, %v1015_v48  ;;  %vm1036_vm15 = vmor %vm1034_vm13, %vm1035_vm11  ;;  %v1053_v6 = vand.u32 2147483647, %v1013_v22  ;;  %v1056_v8 = vor.u32 1.1754944e-38, %v1055_v4 }
 0x274   : > { %v1031_v11 = vsub.f32 1.0, %v1030_v25 }
 0x275   : > { %v1017_v52 = vmul.f32 %v1381_v45, %v1016_v10  ;;  %vm1054_vm6 = vcmp.eq.f32.partialorder %v1053_v6, 8.507059e+37 }
 0x276   : > { %v1032_v26 = vmul.f32 %v1383_v47, %v1031_v11 }
 0x277   : > { %v1385_v54 = vpop.eup %1384  ;;  %v1018_v55 = vadd.f32 %v1381_v45, %v1017_v52 }
 0x278   : > { %v1045_v56 = vmul.f32 %v1385_v54, %v1013_v22  ;;  %v1033_v58 = vadd.f32 %v1383_v47, %v1032_v26  ;;  %v1387_v61 = vpop.eup %1386  ;;  %vm1050_vm3 = vweird.f32 %v1385_v54 }
 0x279   : > { %v1022_v18 = vsel %vm1021_vm14, %v1381_v45, %v1018_v55  ;;  %vm1051_vm5 = vmor %vm1049_vm4, %vm1050_vm3 }
 0x27a   : > { %v1046_v62 = vsub.f32 1.0, %v1045_v56  ;;  %v1027_v63 = vsel %vm1024_vm0, %v1026_v57, %v1022_v18  ;;  %v1037_v0 = vsel %vm1036_vm15, %v1383_v47, %v1033_v58 }
 0x27b   : > { %v1042_v17 = vsel %vm1039_vm1, %v1041_v59, %v1037_v0  ;;  %v1061_v34 = vmul.f32 %v1387_v61, %v1027_v63 }
 0x27c   : > { %v1047_v51 = vmul.f32 %v1385_v54, %v1046_v62  ;;  %v1060_v1 = vmul.f32 %v1042_v17, %v2163_v15 }
 0x27e   : > { %v1062_v2 = vadd.f32 %v1061_v34, %v1060_v1  ;;  %v1048_v3 = vadd.f32 %v1385_v54, %v1047_v51 }
 0x280   : > { %1388 = vtanh.f32 %v1062_v2  ;;  %v1071_v5 = vsel %vm1069_vm2, %v1062_v2, %v2163_v15  ;;  %v1052_v7 = vsel %vm1051_vm5, %v1385_v54, %v1048_v3 }
 0x281   : > { %1073 = vst [vmem:[#allocation3] sm:$0xff] %v1071_v5  ;;  %v1057_v12 = vsel %vm1054_vm6, %v1056_v8, %v1052_v7 }
 0x286   : > { %v1389_v9 = vpop.eup %1388  ;;  %1077 = sbr.rel (%p1242_p6) target bundleno = 812 (0x32c), region = 72 }
 0x287   : > { %v1064_v13 = vmul.f32 %v1389_v9, %v1057_v12 }
 0x289   : > { %v1070_v14 = vsel %vm1069_vm2, %v1064_v13, %v2167_v30 }
 0x28a   : > { %1072 = vst [vmem:[#allocation2] sm:$0xff] %v1070_v14 }
 0x28b   : > { %v1093_v19 = vld [vmem:[#allocation13 + $0x78] sm:$0xff]  ;;  %v1092_v20 = vld [vmem:[#allocation13 + $0x70] sm:$0xff]  ;;  %v1091_v15 = vld [vmem:[#allocation13 + $0x68] sm:$0xff]  ;;  %v1094_v39 = vmax.f32 %v1070_v14, 0.0 }
 0x28c   : > { %1099 = vmatpush.msra.mxu0 %v1093_v19  ;;  %v1090_v24 = vld [vmem:[#allocation13 + $0x60] sm:$0xff]  ;;  %v1089_v27 = vld [vmem:[#allocation13 + $0x58] sm:$0xff]  ;;  %v1088_v28 = vld [vmem:[#allocation13 + $0x50] sm:$0xff] }
 0x28d   : > { %v1087_v29 = vld [vmem:[#allocation13 + $0x48] sm:$0xff]  ;;  %v1086_v23 = vld [vmem:[#allocation13 + $0x40] sm:$0xff]  ;;  %v1085_v30 = vld [vmem:[#allocation13 + $0x38] sm:$0xff] }
 0x28e   : > { %1100 = vmatpush.msra.mxu0 %v1092_v20  ;;  %v1084_v31 = vld [vmem:[#allocation13 + $0x30] sm:$0xff]  ;;  %v1083_v32 = vld [vmem:[#allocation13 + $0x28] sm:$0xff]  ;;  %v1082_v35 = vld [vmem:[#allocation13 + $0x20] sm:$0xff] }
 0x28f   : > { %v1081_v36 = vld [vmem:[#allocation13 + $0x18] sm:$0xff]  ;;  %v1080_v37 = vld [vmem:[#allocation13 + $0x10] sm:$0xff]  ;;  %v1079_v33 = vld [vmem:[#allocation13 + $0x8] sm:$0xff] }
 0x290   : > { %1101 = vmatpush.msra.mxu0 %v1091_v15  ;;  %v1078_v38 = vld [vmem:[#allocation13] sm:$0xff]  ;;  %v1390_v40 = vld [vmem:[%s2215_s5] ss:$0 sm:$0xff] }
 0x292   : > { %1102 = vmatpush.msra.mxu0 %v1090_v24 }
 0x294   : > { %1103 = vmatpush.msra.mxu0 %v1089_v27 }
 0x296   : > { %1104 = vmatpush.msra.mxu0 %v1088_v28 }
 0x298   : > { %1105 = vmatpush.msra.mxu0 %v1087_v29 }
 0x29a   : > { %1106 = vmatpush.msra.mxu0 %v1086_v23 }
 0x29c   : > { %1107 = vmatpush.msra.mxu0 %v1085_v30 }
 0x29e   : > { %1108 = vmatpush.msra.mxu0 %v1084_v31 }
 0x2a0   : > { %1109 = vmatpush.msra.mxu0 %v1083_v32 }
 0x2a2   : > { %1110 = vmatpush.msra.mxu0 %v1082_v35 }
 0x2a4   : > { %1111 = vmatpush.msra.mxu0 %v1081_v36 }
 0x2a6   : > { %1112 = vmatpush.msra.mxu0 %v1080_v37 }
 0x2a8   : > { %1113 = vmatpush.msra.mxu0 %v1079_v33 }
 0x2aa   : > { %1114 = vmatpush.msra.mxu0 %v1078_v38 }
 0x2ab   : > { %1115 = vmatmul.f32.vlgmr.msra.gmra.mxu0 %v1094_v39 }
 0x328   : > { %v1116_v41 = vpop.f32.mrf.mxu0 }
 0x329   : > { %v1117_v42 = vadd.f32 %v1390_v40, %v1116_v41 }
 0x32b   : > { %1119 = vst [vmem:[#allocation14] sm:$0xff] %v1117_v42 }
 0x32c PF: > { %p1298_p13 = scmp.eq.s32.totalorder %s1681_s25, 2  ;;  %s1626_s24 = smov [#allocation14]  }
 0x32d   : > { %s1126_s16 = sshll.u32 %s1626_s24, 4  ;;  %s1128_s19 = sshll.u32 %s2216_s6, 4  ;;  %s1127_s16 = int_to_ptr.vmem [resolvable:$true] %s1126_s16  ;;  %s1129_s19 = int_to_ptr.hbm [resolvable:$true] %s1128_s19 }
 0x32e   : > { %1269 = dma.vmem_to_hbm [thread:$0]  (%p1298_p13), %s1127_s16, 128, %s1129_s19, [#allocation7]  }
 0x32f   : > { %1598 = dma.done.wait (%p1298_p13), [#allocation7], 128  }
 0x330   : > { %1600 = vsyncadd (%p1298_p13), [#allocation7], 4294967168 }
 0x331 PF: > { %p19_p0 = scmp.ge.s32.totalorder %s1730_s12, 5   ;;  %s2232_s21 = smov %s1607_s22 }
 0x332   : > { %s2233_s22 = smov %s1611_s23  ;;  %s2234_s23 = smov %s1739_s13 }
 0x333   : > { %s2235_s24 = smov %s1730_s12  ;;  %21 = sbr.rel (!%p19_p0) target bundleno = 6 (0x6), region = 108 }
 0x338   :  { %1142 = vsyncpa [#allocation6], 1 }
 0x339   :  { %1144 = vsyncpa [#allocation6 + $0x1], 1 }
 0x33a   :  { %1145 = vsyncpa [#allocation9], 1 }
 0x33b   :  { %1146 = vsyncpa [#allocation12], 1 }
 0x33c   :  { %1147 = vsyncpa [#allocation7], 1 }
 0x33d   :  { %1149 = vsyncpa [#allocation7 + $0x1], 1 }

</bundles_post_ra>
